<compile_context>
chip_gen: v5e
topology: v5e:2x2
jax: 0.10.0
libtpu: 0.0.40
codegen_flags: <defaults>
</compile_context>

<pallas_src>
import functools

import jax
import jax.numpy as jnp
from jax.experimental import pallas as pl
from jax.experimental.pallas import tpu as pltpu


TILE_M_MAX = 256            # safe across v5e/v6e/v7x (raise to 512-1024 on v6e)
TILE_K_MAX = 512
VMEM_LIMIT = 32 * 1024 * 1024
LEAKY_SLOPE = 0.2
BN_EPS = 1e-5


def _round_up(x, m):
    return (x + m - 1) // m * m


# ---------------------------------------------------------------------------
# Kernel 1: tiled matmul + bias + optional LeakyReLU   (layers without BN)
# grid = (M_tiles, K_tiles); f32 accumulator in VMEM scratch.
# ---------------------------------------------------------------------------
def _conv_bias_act_kernel(p_ref, w_ref, b_ref, o_ref, acc_ref, *, use_act, slope):
    k = pl.program_id(1)

    @pl.when(k == 0)
    def _():
        acc_ref[...] = jnp.zeros_like(acc_ref)

    acc_ref[...] += jnp.dot(p_ref[...], w_ref[...],
                            preferred_element_type=jnp.float32)

    @pl.when(k == pl.num_programs(1) - 1)
    def _():
        out = acc_ref[...] + b_ref[...]
        if use_act:
            out = jnp.where(out >= 0, out, slope * out)     # LeakyReLU(0.2)
        o_ref[...] = out.astype(o_ref.dtype)


def conv_bias_act(patches, w_mat, bias, *, use_act, tile_m, tile_k):
    M_pad, K_pad = patches.shape
    C = w_mat.shape[1]
    grid = (M_pad // tile_m, K_pad // tile_k)
    kernel = functools.partial(_conv_bias_act_kernel, use_act=use_act,
                               slope=LEAKY_SLOPE)
    return pl.pallas_call(
        kernel,
        out_shape=jax.ShapeDtypeStruct((M_pad, C), jnp.float32),
        grid_spec=pltpu.PrefetchScalarGridSpec(
            num_scalar_prefetch=0,
            grid=grid,
            in_specs=[
                pl.BlockSpec((tile_m, tile_k), lambda m, k: (m, k)),
                pl.BlockSpec((tile_k, C), lambda m, k: (k, 0)),
                pl.BlockSpec((1, C), lambda m, k: (0, 0)),
            ],
            out_specs=pl.BlockSpec((tile_m, C), lambda m, k: (m, 0)),
            scratch_shapes=[pltpu.VMEM((tile_m, C), jnp.float32)],
        ),
        compiler_params=pltpu.CompilerParams(
            dimension_semantics=("parallel", "arbitrary"),
            vmem_limit_bytes=VMEM_LIMIT),
    )(patches, w_mat, bias)


# ---------------------------------------------------------------------------
# Kernel 2: tiled matmul + per-channel sum / sum-of-squares  (BN layers)
# Bias is skipped (train-mode BN cancels it).  Stats output is a (2, C) f32
# accumulator resident across the whole grid -> both axes "arbitrary".
# ---------------------------------------------------------------------------
def _conv_stats_kernel(p_ref, w_ref, o_ref, stats_ref, acc_ref, *, m_true, tile_m):
    m = pl.program_id(0)
    k = pl.program_id(1)

    @pl.when(jnp.logical_and(m == 0, k == 0))
    def _():
        stats_ref[...] = jnp.zeros_like(stats_ref)

    @pl.when(k == 0)
    def _():
        acc_ref[...] = jnp.zeros_like(acc_ref)

    acc_ref[...] += jnp.dot(p_ref[...], w_ref[...],
                            preferred_element_type=jnp.float32)

    @pl.when(k == pl.num_programs(1) - 1)
    def _():
        acc = acc_ref[...]
        o_ref[...] = acc
        # mask out zero-padded M rows so batch statistics use true rows only
        row = m * tile_m + jax.lax.broadcasted_iota(jnp.int32, (tile_m, 1), 0)
        masked = jnp.where(row < m_true, acc, 0.0)
        stats_ref[0:1, :] += jnp.sum(masked, axis=0, keepdims=True)
        stats_ref[1:2, :] += jnp.sum(masked * masked, axis=0, keepdims=True)


def conv_with_stats(patches, w_mat, *, m_true, tile_m, tile_k):
    M_pad, K_pad = patches.shape
    C = w_mat.shape[1]
    grid = (M_pad // tile_m, K_pad // tile_k)
    kernel = functools.partial(_conv_stats_kernel, m_true=m_true, tile_m=tile_m)
    return pl.pallas_call(
        kernel,
        out_shape=(jax.ShapeDtypeStruct((M_pad, C), jnp.float32),
                   jax.ShapeDtypeStruct((2, C), jnp.float32)),
        grid_spec=pltpu.PrefetchScalarGridSpec(
            num_scalar_prefetch=0,
            grid=grid,
            in_specs=[
                pl.BlockSpec((tile_m, tile_k), lambda m, k: (m, k)),
                pl.BlockSpec((tile_k, C), lambda m, k: (k, 0)),
            ],
            out_specs=(pl.BlockSpec((tile_m, C), lambda m, k: (m, 0)),
                       pl.BlockSpec((2, C), lambda m, k: (0, 0))),
            scratch_shapes=[pltpu.VMEM((tile_m, C), jnp.float32)],
        ),
        compiler_params=pltpu.CompilerParams(
            # stats output is an accumulator across both grid axes
            dimension_semantics=("arbitrary", "arbitrary"),
            vmem_limit_bytes=VMEM_LIMIT),
    )(patches, w_mat)


# ---------------------------------------------------------------------------
# Kernel 3: apply train-mode BatchNorm (from accumulated stats) + LeakyReLU
# ---------------------------------------------------------------------------
def _bn_act_kernel(y_ref, stats_ref, g_ref, b_ref, o_ref, *, m_true, eps, slope):
    inv_m = 1.0 / m_true
    mean = stats_ref[0:1, :] * inv_m
    var = jnp.maximum(stats_ref[1:2, :] * inv_m - mean * mean, 0.0)
    inv_std = jax.lax.rsqrt(var + eps)
    out = (y_ref[...] - mean) * inv_std * g_ref[...] + b_ref[...]
    o_ref[...] = jnp.where(out >= 0, out, slope * out).astype(o_ref.dtype)


def batchnorm_leaky(y, stats, gamma, beta, *, m_true, tile_m):
    M_pad, C = y.shape
    grid = (M_pad // tile_m,)
    kernel = functools.partial(_bn_act_kernel, m_true=float(m_true),
                               eps=BN_EPS, slope=LEAKY_SLOPE)
    return pl.pallas_call(
        kernel,
        out_shape=jax.ShapeDtypeStruct((M_pad, C), jnp.float32),
        grid_spec=pltpu.PrefetchScalarGridSpec(
            num_scalar_prefetch=0,
            grid=grid,
            in_specs=[
                pl.BlockSpec((tile_m, C), lambda m: (m, 0)),
                pl.BlockSpec((2, C), lambda m: (0, 0)),
                pl.BlockSpec((1, C), lambda m: (0, 0)),
                pl.BlockSpec((1, C), lambda m: (0, 0)),
            ],
            out_specs=pl.BlockSpec((tile_m, C), lambda m: (m, 0)),
        ),
        compiler_params=pltpu.CompilerParams(
            dimension_semantics=("parallel",),
            vmem_limit_bytes=VMEM_LIMIT),
    )(y, stats, gamma, beta)


# ---------------------------------------------------------------------------
# XLA-side glue: im2col (bf16), weight repack, layer wrapper
# ---------------------------------------------------------------------------
def im2col_bf16(x_nhwc, k, stride, pad_h, pad_w):
    """(N,H,W,C) -> bf16 patches (M_pad, K_pad), ordered (kh, kw, c)."""
    x = jnp.pad(x_nhwc, ((0, 0), pad_h, pad_w, (0, 0)))
    N, H, W, C = x.shape
    Ho = (H - k) // stride + 1
    Wo = (W - k) // stride + 1
    cols = []
    for i in range(k):
        for j in range(k):
            cols.append(x[:, i:i + stride * Ho:stride,
                          j:j + stride * Wo:stride, :])
    p = jnp.stack(cols, axis=3).reshape(N * Ho * Wo, k * k * C)
    M, K = N * Ho * Wo, k * k * C

    K128 = _round_up(K, 128)                 # lane-align K
    tile_k = min(TILE_K_MAX, K128)
    K_pad = _round_up(K128, tile_k)

    M16 = _round_up(M, 16)                   # bf16-friendly sublane multiple
    tile_m = min(TILE_M_MAX, M16)
    M_pad = _round_up(M16, tile_m)

    p = jnp.pad(p, ((0, M_pad - M), (0, K_pad - K))).astype(jnp.bfloat16)
    return p, (N, Ho, Wo), M, tile_m, tile_k, K_pad


def prep_weight(w_oikk, K_pad, C_pad):
    """(C_out, C_in, kh, kw) -> bf16 (K_pad, C_pad), matching im2col order."""
    C_out = w_oikk.shape[0]
    K = w_oikk.shape[1] * w_oikk.shape[2] * w_oikk.shape[3]
    w = jnp.transpose(w_oikk, (2, 3, 1, 0)).reshape(K, C_out)
    w = jnp.pad(w, ((0, K_pad - K), (0, C_pad - C_out)))
    return w.astype(jnp.bfloat16)


def conv_block(h, w, b, gamma=None, beta=None, *, use_bn, use_act,
               stride, pad_h, pad_w):
    c_out = w.shape[0]
    c_pad = _round_up(c_out, 128)            # lane-dense output (pads 64 / 1 -> 128)
    patches, (N, Ho, Wo), m_true, tile_m, tile_k, K_pad = im2col_bf16(
        h, 4, stride, pad_h, pad_w)
    w_mat = prep_weight(w, K_pad, c_pad)

    if use_bn:
        y, stats = conv_with_stats(patches, w_mat, m_true=m_true,
                                   tile_m=tile_m, tile_k=tile_k)
        g = jnp.pad(gamma, (0, c_pad - c_out)).reshape(1, c_pad).astype(jnp.float32)
        be = jnp.pad(beta, (0, c_pad - c_out)).reshape(1, c_pad).astype(jnp.float32)
        y = batchnorm_leaky(y, stats, g, be, m_true=m_true, tile_m=tile_m)
    else:
        bias = jnp.pad(b, (0, c_pad - c_out)).reshape(1, c_pad).astype(jnp.float32)
        y = conv_bias_act(patches, w_mat, bias, use_act=use_act,
                          tile_m=tile_m, tile_k=tile_k)

    return y[:m_true, :c_out].reshape(N, Ho, Wo, c_out)


# ---------------------------------------------------------------------------
# Discriminator forward
# ---------------------------------------------------------------------------
def make_params(key, in_channels=3):
    """Deterministic synthetic parameters matching the PyTorch module shapes."""
    ks = jax.random.split(key, 16)
    p = {}

    def conv(i, c_in, c_out):
        w = 0.02 * jax.random.normal(ks[2 * i], (c_out, c_in, 4, 4), jnp.float32)
        b = 0.01 * jax.random.normal(ks[2 * i + 1], (c_out,), jnp.float32)
        return w, b

    p["w1"], p["b1"] = conv(0, in_channels * 2, 64)
    p["w2"], p["b2"] = conv(1, 64, 128)
    p["w3"], p["b3"] = conv(2, 128, 256)
    p["w4"], p["b4"] = conv(3, 256, 1)
    p["g2"] = 1.0 + 0.05 * jax.random.normal(ks[8], (128,), jnp.float32)
    p["be2"] = 0.05 * jax.random.normal(ks[9], (128,), jnp.float32)
    p["g3"] = 1.0 + 0.05 * jax.random.normal(ks[10], (256,), jnp.float32)
    p["be3"] = 0.05 * jax.random.normal(ks[11], (256,), jnp.float32)
    return p


def discriminator_forward(x_nchw, y_nchw, p):
    # concat along channels (PyTorch dim=1), then NHWC for the kernels.
    h = jnp.concatenate([x_nchw, y_nchw], axis=1)
    h = jnp.transpose(h, (0, 2, 3, 1)).astype(jnp.float32)

    # block(in*2, 64, norm=False)
    h = conv_block(h, p["w1"], p["b1"], use_bn=False, use_act=True,
                   stride=2, pad_h=(1, 1), pad_w=(1, 1))
    # block(64, 128)  -- bias dropped: train-mode BN cancels it exactly
    h = conv_block(h, p["w2"], None, p["g2"], p["be2"], use_bn=True,
                   use_act=True, stride=2, pad_h=(1, 1), pad_w=(1, 1))
    # block(128, 256)
    h = conv_block(h, p["w3"], None, p["g3"], p["be3"], use_bn=True,
                   use_act=True, stride=2, pad_h=(1, 1), pad_w=(1, 1))
    # ZeroPad2d((left=1, right=0, top=1, bottom=0)) in NHWC
    h = jnp.pad(h, ((0, 0), (1, 0), (1, 0), (0, 0)))
    # Conv2d(256, 1, 4, stride=1, padding=1), no norm, no activation
    h = conv_block(h, p["w4"], p["b4"], use_bn=False, use_act=False,
                   stride=1, pad_h=(1, 1), pad_w=(1, 1))

    return jnp.transpose(h, (0, 3, 1, 2))                 # back to NCHW


if __name__ == "__main__":
    key = jax.random.PRNGKey(0)
    k_x, k_y, k_p = jax.random.split(key, 3)

    N, C, H, W = 2, 3, 16, 16
    x = jax.random.normal(k_x, (N, C, H, W), jnp.float32)
    y = jax.random.normal(k_y, (N, C, H, W), jnp.float32)
    params = make_params(k_p, in_channels=C)

    out = jax.jit(discriminator_forward)(x, y, params)
    out = jax.block_until_ready(out)

    # 16x16 input -> 8 -> 4 -> 2 -> zero-pad(3) -> conv(k4,p1) -> 2
    assert out.shape == (N, 1, 2, 2), out.shape
    assert jnp.all(jnp.isfinite(out))
    print("KERNEL_OK")
</pallas_src>

<mosaic_0001>
module attributes {stable_mosaic.version = 11 : i64} {
  func.func @_conv_bias_act_kernel(%arg0: i32, %arg1: i32, %arg2: memref<128x128xbf16, #tpu.memory_space<vmem>>, %arg3: memref<128x128xbf16, #tpu.memory_space<vmem>>, %arg4: memref<1x128xf32, #tpu.memory_space<vmem>>, %arg5: memref<128x128xf32, #tpu.memory_space<vmem>>, %arg6: memref<128x128xf32, #tpu.memory_space<vmem>>) attributes {dimension_semantics = [#tpu.dimension_semantics<parallel>, #tpu.dimension_semantics<arbitrary>], iteration_bounds = array<i64: 1, 1>, scalar_prefetch = 0 : i64, scratch_operands = 1 : i64, tpu.core_type = #tpu.core_type<tc>, window_params = [{transform_indices = @transform_0, window_bounds = array<i64: 128, 128>}, {transform_indices = @transform_1, window_bounds = array<i64: 128, 128>}, {pipeline_mode = #tpu.pipeline_mode<synchronous>, transform_indices = @transform_2, window_bounds = array<i64: 1, 128>}, {transform_indices = @transform_3, window_bounds = array<i64: 128, 128>}]} {
    %c0_i32 = arith.constant 0 : i32
    %0 = arith.cmpi eq, %arg1, %c0_i32 : i32
    %1 = arith.extui %0 : i1 to i32
    %c0_i32_0 = arith.constant 0 : i32
    %2 = arith.cmpi ne, %1, %c0_i32_0 : i32
    scf.if %2 {
      %cst_10 = arith.constant 0.000000e+00 : f32
      %12 = vector.broadcast %cst_10 : f32 to vector<128x128xf32>
      %c0_11 = arith.constant 0 : index
      %c0_12 = arith.constant 0 : index
      %13 = vector.load %arg6[%c0_11, %c0_12] : memref<128x128xf32, #tpu.memory_space<vmem>>, vector<128x128xf32>
      tpu.vector_store %arg6[%c0_11, %c0_12], %12 {strides = array<i32>} : memref<128x128xf32, #tpu.memory_space<vmem>>, vector<128x128xf32>,
    } else {
    }
    %c0 = arith.constant 0 : index
    %c0_1 = arith.constant 0 : index
    %3 = vector.load %arg6[%c0, %c0_1] : memref<128x128xf32, #tpu.memory_space<vmem>>, vector<128x128xf32>
    %c0_2 = arith.constant 0 : index
    %c0_3 = arith.constant 0 : index
    %4 = vector.load %arg2[%c0_2, %c0_3] : memref<128x128xbf16, #tpu.memory_space<vmem>>, vector<128x128xbf16>
    %c0_4 = arith.constant 0 : index
    %c0_5 = arith.constant 0 : index
    %5 = vector.load %arg3[%c0_4, %c0_5] : memref<128x128xbf16, #tpu.memory_space<vmem>>, vector<128x128xbf16>
    %cst = arith.constant dense<0.000000e+00> : vector<128x128xf32>
    %6 = tpu.matmul %4, %5, %cst {dimension_numbers = #tpu.dot_dimension_numbers<[1], [0], [0], [1], [0, 0, 1, 1], [], []>} : vector<128x128xbf16>, vector<128x128xbf16>, vector<128x128xf32> -> vector<128x128xf32>
    %7 = arith.addf %3, %6 : vector<128x128xf32>
    %c0_6 = arith.constant 0 : index
    %c0_7 = arith.constant 0 : index
    %8 = vector.load %arg6[%c0_6, %c0_7] : memref<128x128xf32, #tpu.memory_space<vmem>>, vector<128x128xf32>
    tpu.vector_store %arg6[%c0_6, %c0_7], %7 {strides = array<i32>} : memref<128x128xf32, #tpu.memory_space<vmem>>, vector<128x128xf32>,
    %c0_i32_8 = arith.constant 0 : i32
    %9 = arith.cmpi eq, %arg1, %c0_i32_8 : i32
    %10 = arith.extui %9 : i1 to i32
    %c0_i32_9 = arith.constant 0 : i32
    %11 = arith.cmpi ne, %10, %c0_i32_9 : i32
    scf.if %11 {
      %c0_10 = arith.constant 0 : index
      %c0_11 = arith.constant 0 : index
      %12 = vector.load %arg6[%c0_10, %c0_11] : memref<128x128xf32, #tpu.memory_space<vmem>>, vector<128x128xf32>
      %c0_12 = arith.constant 0 : index
      %c0_13 = arith.constant 0 : index
      %13 = vector.load %arg4[%c0_12, %c0_13] : memref<1x128xf32, #tpu.memory_space<vmem>>, vector<1x128xf32>
      %14 = vector.broadcast %13 : vector<1x128xf32> to vector<128x128xf32>
      %15 = arith.addf %12, %14 : vector<128x128xf32>
      %cst_14 = arith.constant 0.000000e+00 : f32
      %16 = vector.broadcast %cst_14 : f32 to vector<128x128xf32>
      %17 = arith.cmpf oge, %15, %16 : vector<128x128xf32>
      %cst_15 = arith.constant 2.000000e-01 : f32
      %18 = vector.broadcast %cst_15 : f32 to vector<128x128xf32>
      %19 = arith.mulf %18, %15 : vector<128x128xf32>
      %20 = arith.select %17, %15, %19 : vector<128x128xi1>, vector<128x128xf32>
      %c0_16 = arith.constant 0 : index
      %c0_17 = arith.constant 0 : index
      %21 = vector.load %arg5[%c0_16, %c0_17] : memref<128x128xf32, #tpu.memory_space<vmem>>, vector<128x128xf32>
      tpu.vector_store %arg5[%c0_16, %c0_17], %20 {strides = array<i32>} : memref<128x128xf32, #tpu.memory_space<vmem>>, vector<128x128xf32>,
    } else {
    }
    return
  }
  func.func @transform_0(%arg0: i32, %arg1: i32) -> (i32, i32) {
    %c0_i32 = arith.constant 0 : i32
    return %arg0, %arg1 : i32, i32
  }
  func.func @transform_1(%arg0: i32, %arg1: i32) -> (i32, i32) {
    %c0_i32 = arith.constant 0 : i32
    %c0_i32_0 = arith.constant 0 : i32
    return %arg1, %c0_i32 : i32, i32
  }
  func.func @transform_2(%arg0: i32, %arg1: i32) -> (i32, i32) {
    %c0_i32 = arith.constant 0 : i32
    %c0_i32_0 = arith.constant 0 : i32
    %c0_i32_1 = arith.constant 0 : i32
    return %c0_i32, %c0_i32_0 : i32, i32
  }
  func.func @transform_3(%arg0: i32, %arg1: i32) -> (i32, i32) {
    %c0_i32 = arith.constant 0 : i32
    %c0_i32_0 = arith.constant 0 : i32
    return %arg0, %c0_i32 : i32, i32
  }
}

module attributes {stable_mosaic.version = 11 : i64} {
  func.func @_bn_act_kernel(%arg0: i32, %arg1: memref<32x128xf32, #tpu.memory_space<vmem>>, %arg2: memref<2x128xf32, #tpu.memory_space<vmem>>, %arg3: memref<1x128xf32, #tpu.memory_space<vmem>>, %arg4: memref<1x128xf32, #tpu.memory_space<vmem>>, %arg5: memref<32x128xf32, #tpu.memory_space<vmem>>) attributes {dimension_semantics = [#tpu.dimension_semantics<parallel>], iteration_bounds = array<i64: 1>, scalar_prefetch = 0 : i64, scratch_operands = 0 : i64, tpu.core_type = #tpu.core_type<tc>, window_params = [{transform_indices = @transform_0, window_bounds = array<i64: 32, 128>}, {pipeline_mode = #tpu.pipeline_mode<synchronous>, transform_indices = @transform_1, window_bounds = array<i64: 2, 128>}, {pipeline_mode = #tpu.pipeline_mode<synchronous>, transform_indices = @transform_2, window_bounds = array<i64: 1, 128>}, {pipeline_mode = #tpu.pipeline_mode<synchronous>, transform_indices = @transform_3, window_bounds = array<i64: 1, 128>}, {transform_indices = @transform_4, window_bounds = array<i64: 32, 128>}]} {
    %c0 = arith.constant 0 : index
    %c0_0 = arith.constant 0 : index
    %0 = vector.load %arg2[%c0, %c0_0] : memref<2x128xf32, #tpu.memory_space<vmem>>, vector<1x128xf32>
    %cst = arith.constant 3.125000e-02 : f32
    %1 = vector.broadcast %cst : f32 to vector<1x128xf32>
    %2 = arith.mulf %0, %1 : vector<1x128xf32>
    %c1 = arith.constant 1 : index
    %c0_1 = arith.constant 0 : index
    %3 = vector.load %arg2[%c1, %c0_1] : memref<2x128xf32, #tpu.memory_space<vmem>>, vector<1x128xf32>
    %cst_2 = arith.constant 3.125000e-02 : f32
    %4 = vector.broadcast %cst_2 : f32 to vector<1x128xf32>
    %5 = arith.mulf %3, %4 : vector<1x128xf32>
    %6 = arith.mulf %2, %2 : vector<1x128xf32>
    %7 = arith.subf %5, %6 : vector<1x128xf32>
    %cst_3 = arith.constant 0.000000e+00 : f32
    %8 = vector.broadcast %cst_3 : f32 to vector<1x128xf32>
    %9 = arith.maximumf %7, %8 : vector<1x128xf32>
    %cst_4 = arith.constant 9.99999974E-6 : f32
    %10 = vector.broadcast %cst_4 : f32 to vector<1x128xf32>
    %11 = arith.addf %9, %10 : vector<1x128xf32>
    %12 = math.rsqrt %11 : vector<1x128xf32>
    %c0_5 = arith.constant 0 : index
    %c0_6 = arith.constant 0 : index
    %13 = vector.load %arg1[%c0_5, %c0_6] : memref<32x128xf32, #tpu.memory_space<vmem>>, vector<32x128xf32>
    %14 = vector.broadcast %2 : vector<1x128xf32> to vector<32x128xf32>
    %15 = arith.subf %13, %14 : vector<32x128xf32>
    %16 = vector.broadcast %12 : vector<1x128xf32> to vector<32x128xf32>
    %17 = arith.mulf %15, %16 : vector<32x128xf32>
    %c0_7 = arith.constant 0 : index
    %c0_8 = arith.constant 0 : index
    %18 = vector.load %arg3[%c0_7, %c0_8] : memref<1x128xf32, #tpu.memory_space<vmem>>, vector<1x128xf32>
    %19 = vector.broadcast %18 : vector<1x128xf32> to vector<32x128xf32>
    %20 = arith.mulf %17, %19 : vector<32x128xf32>
    %c0_9 = arith.constant 0 : index
    %c0_10 = arith.constant 0 : index
    %21 = vector.load %arg4[%c0_9, %c0_10] : memref<1x128xf32, #tpu.memory_space<vmem>>, vector<1x128xf32>
    %22 = vector.broadcast %21 : vector<1x128xf32> to vector<32x128xf32>
    %23 = arith.addf %20, %22 : vector<32x128xf32>
    %cst_11 = arith.constant 0.000000e+00 : f32
    %24 = vector.broadcast %cst_11 : f32 to vector<32x128xf32>
    %25 = arith.cmpf oge, %23, %24 : vector<32x128xf32>
    %cst_12 = arith.constant 2.000000e-01 : f32
    %26 = vector.broadcast %cst_12 : f32 to vector<32x128xf32>
    %27 = arith.mulf %26, %23 : vector<32x128xf32>
    %28 = arith.select %25, %23, %27 : vector<32x128xi1>, vector<32x128xf32>
    %c0_13 = arith.constant 0 : index
    %c0_14 = arith.constant 0 : index
    %29 = vector.load %arg5[%c0_13, %c0_14] : memref<32x128xf32, #tpu.memory_space<vmem>>, vector<32x128xf32>
    tpu.vector_store %arg5[%c0_13, %c0_14], %28 {strides = array<i32>} : memref<32x128xf32, #tpu.memory_space<vmem>>, vector<32x128xf32>,
    return
  }
  func.func @transform_0(%arg0: i32) -> (i32, i32) {
    %c0_i32 = arith.constant 0 : i32
    %c0_i32_0 = arith.constant 0 : i32
    return %arg0, %c0_i32 : i32, i32
  }
  func.func @transform_1(%arg0: i32) -> (i32, i32) {
    %c0_i32 = arith.constant 0 : i32
    %c0_i32_0 = arith.constant 0 : i32
    %c0_i32_1 = arith.constant 0 : i32
    return %c0_i32, %c0_i32_0 : i32, i32
  }
  func.func @transform_2(%arg0: i32) -> (i32, i32) {
    %c0_i32 = arith.constant 0 : i32
    %c0_i32_0 = arith.constant 0 : i32
    %c0_i32_1 = arith.constant 0 : i32
    return %c0_i32, %c0_i32_0 : i32, i32
  }
  func.func @transform_3(%arg0: i32) -> (i32, i32) {
    %c0_i32 = arith.constant 0 : i32
    %c0_i32_0 = arith.constant 0 : i32
    %c0_i32_1 = arith.constant 0 : i32
    return %c0_i32, %c0_i32_0 : i32, i32
  }
  func.func @transform_4(%arg0: i32) -> (i32, i32) {
    %c0_i32 = arith.constant 0 : i32
    %c0_i32_0 = arith.constant 0 : i32
    return %arg0, %c0_i32 : i32, i32
  }
}

module attributes {stable_mosaic.version = 11 : i64} {
  func.func @_conv_stats_kernel(%arg0: i32, %arg1: i32, %arg2: memref<32x512xbf16, #tpu.memory_space<vmem>>, %arg3: memref<512x128xbf16, #tpu.memory_space<vmem>>, %arg4: memref<32x128xf32, #tpu.memory_space<vmem>>, %arg5: memref<2x128xf32, #tpu.memory_space<vmem>>, %arg6: memref<32x128xf32, #tpu.memory_space<vmem>>) attributes {dimension_semantics = [#tpu.dimension_semantics<arbitrary>, #tpu.dimension_semantics<arbitrary>], iteration_bounds = array<i64: 1, 2>, scalar_prefetch = 0 : i64, scratch_operands = 1 : i64, tpu.core_type = #tpu.core_type<tc>, window_params = [{transform_indices = @transform_0, window_bounds = array<i64: 32, 512>}, {transform_indices = @transform_1, window_bounds = array<i64: 512, 128>}, {transform_indices = @transform_2, window_bounds = array<i64: 32, 128>}, {pipeline_mode = #tpu.pipeline_mode<synchronous>, transform_indices = @transform_3, window_bounds = array<i64: 2, 128>}]} {
    %c0_i32 = arith.constant 0 : i32
    %0 = arith.cmpi eq, %arg0, %c0_i32 : i32
    %c0_i32_0 = arith.constant 0 : i32
    %1 = arith.cmpi eq, %arg1, %c0_i32_0 : i32
    %2 = arith.andi %0, %1 : i1
    %3 = arith.extui %2 : i1 to i32
    %c0_i32_1 = arith.constant 0 : i32
    %4 = arith.cmpi ne, %3, %c0_i32_1 : i32
    scf.if %4 {
      %cst_12 = arith.constant 0.000000e+00 : f32
      %17 = vector.broadcast %cst_12 : f32 to vector<2x128xf32>
      %c0_13 = arith.constant 0 : index
      %c0_14 = arith.constant 0 : index
      %18 = vector.load %arg5[%c0_13, %c0_14] : memref<2x128xf32, #tpu.memory_space<vmem>>, vector<2x128xf32>
      tpu.vector_store %arg5[%c0_13, %c0_14], %17 {strides = array<i32>} : memref<2x128xf32, #tpu.memory_space<vmem>>, vector<2x128xf32>,
    } else {
    }
    %c0_i32_2 = arith.constant 0 : i32
    %5 = arith.cmpi eq, %arg1, %c0_i32_2 : i32
    %6 = arith.extui %5 : i1 to i32
    %c0_i32_3 = arith.constant 0 : i32
    %7 = arith.cmpi ne, %6, %c0_i32_3 : i32
    scf.if %7 {
      %cst_12 = arith.constant 0.000000e+00 : f32
      %17 = vector.broadcast %cst_12 : f32 to vector<32x128xf32>
      %c0_13 = arith.constant 0 : index
      %c0_14 = arith.constant 0 : index
      %18 = vector.load %arg6[%c0_13, %c0_14] : memref<32x128xf32, #tpu.memory_space<vmem>>, vector<32x128xf32>
      tpu.vector_store %arg6[%c0_13, %c0_14], %17 {strides = array<i32>} : memref<32x128xf32, #tpu.memory_space<vmem>>, vector<32x128xf32>,
    } else {
    }
    %c0 = arith.constant 0 : index
    %c0_4 = arith.constant 0 : index
    %8 = vector.load %arg6[%c0, %c0_4] : memref<32x128xf32, #tpu.memory_space<vmem>>, vector<32x128xf32>
    %c0_5 = arith.constant 0 : index
    %c0_6 = arith.constant 0 : index
    %9 = vector.load %arg2[%c0_5, %c0_6] : memref<32x512xbf16, #tpu.memory_space<vmem>>, vector<32x512xbf16>
    %c0_7 = arith.constant 0 : index
    %c0_8 = arith.constant 0 : index
    %10 = vector.load %arg3[%c0_7, %c0_8] : memref<512x128xbf16, #tpu.memory_space<vmem>>, vector<512x128xbf16>
    %cst = arith.constant dense<0.000000e+00> : vector<32x128xf32>
    %11 = tpu.matmul %9, %10, %cst {dimension_numbers = #tpu.dot_dimension_numbers<[1], [0], [0], [1], [0, 0, 1, 1], [], []>} : vector<32x512xbf16>, vector<512x128xbf16>, vector<32x128xf32> -> vector<32x128xf32>
    %12 = arith.addf %8, %11 : vector<32x128xf32>
    %c0_9 = arith.constant 0 : index
    %c0_10 = arith.constant 0 : index
    %13 = vector.load %arg6[%c0_9, %c0_10] : memref<32x128xf32, #tpu.memory_space<vmem>>, vector<32x128xf32>
    tpu.vector_store %arg6[%c0_9, %c0_10], %12 {strides = array<i32>} : memref<32x128xf32, #tpu.memory_space<vmem>>, vector<32x128xf32>,
    %c1_i32 = arith.constant 1 : i32
    %14 = arith.cmpi eq, %arg1, %c1_i32 : i32
    %15 = arith.extui %14 : i1 to i32
    %c0_i32_11 = arith.constant 0 : i32
    %16 = arith.cmpi ne, %15, %c0_i32_11 : i32
    scf.if %16 {
      %c0_12 = arith.constant 0 : index
      %c0_13 = arith.constant 0 : index
      %17 = vector.load %arg6[%c0_12, %c0_13] : memref<32x128xf32, #tpu.memory_space<vmem>>, vector<32x128xf32>
      %c0_14 = arith.constant 0 : index
      %c0_15 = arith.constant 0 : index
      %18 = vector.load %arg4[%c0_14, %c0_15] : memref<32x128xf32, #tpu.memory_space<vmem>>, vector<32x128xf32>
      tpu.vector_store %arg4[%c0_14, %c0_15], %17 {strides = array<i32>} : memref<32x128xf32, #tpu.memory_space<vmem>>, vector<32x128xf32>,
      %c32_i32 = arith.constant 32 : i32
      %19 = arith.muli %arg0, %c32_i32 : i32
      %20 = tpu.iota {dimensions = array<i32: 0>} : vector<32x1xi32>
      %21 = vector.broadcast %19 : i32 to vector<32x1xi32>
      %22 = arith.addi %21, %20 : vector<32x1xi32>
      %c32_i32_16 = arith.constant 32 : i32
      %23 = vector.broadcast %c32_i32_16 : i32 to vector<32x1xi32>
      %24 = arith.cmpi slt, %22, %23 : vector<32x1xi32>
      %cst_17 = arith.constant 0.000000e+00 : f32
      %25 = vector.shape_cast %24 : vector<32x1xi1> to vector<32x1xi1>
      %26 = vector.broadcast %25 : vector<32x1xi1> to vector<32x128xi1>
      %27 = vector.broadcast %cst_17 : f32 to vector<32x128xf32>
      %28 = arith.select %26, %17, %27 : vector<32x128xi1>, vector<32x128xf32>
      %c0_18 = arith.constant 0 : index
      %c0_19 = arith.constant 0 : index
      %29 = vector.load %arg5[%c0_18, %c0_19] : memref<2x128xf32, #tpu.memory_space<vmem>>, vector<1x128xf32>
      %cst_20 = arith.constant dense<0.000000e+00> : vector<128xf32>
      %30 = vector.multi_reduction <add>, %28, %cst_20 [0] : vector<32x128xf32> to vector<128xf32>
      %31 = vector.shape_cast %30 : vector<128xf32> to vector<1x128xf32>
      %32 = arith.addf %29, %31 : vector<1x128xf32>
      %c0_21 = arith.constant 0 : index
      %c0_22 = arith.constant 0 : index
      %33 = vector.load %arg5[%c0_21, %c0_22] : memref<2x128xf32, #tpu.memory_space<vmem>>, vector<1x128xf32>
      tpu.vector_store %arg5[%c0_21, %c0_22], %32 {strides = array<i32>} : memref<2x128xf32, #tpu.memory_space<vmem>>, vector<1x128xf32>,
      %c1 = arith.constant 1 : index
      %c0_23 = arith.constant 0 : index
      %34 = vector.load %arg5[%c1, %c0_23] : memref<2x128xf32, #tpu.memory_space<vmem>>, vector<1x128xf32>
      %35 = arith.mulf %28, %28 : vector<32x128xf32>
      %cst_24 = arith.constant dense<0.000000e+00> : vector<128xf32>
      %36 = vector.multi_reduction <add>, %35, %cst_24 [0] : vector<32x128xf32> to vector<128xf32>
      %37 = vector.shape_cast %36 : vector<128xf32> to vector<1x128xf32>
      %38 = arith.addf %34, %37 : vector<1x128xf32>
      %c1_25 = arith.constant 1 : index
      %c0_26 = arith.constant 0 : index
      %39 = vector.load %arg5[%c1_25, %c0_26] : memref<2x128xf32, #tpu.memory_space<vmem>>, vector<1x128xf32>
      tpu.vector_store %arg5[%c1_25, %c0_26], %38 {strides = array<i32>} : memref<2x128xf32, #tpu.memory_space<vmem>>, vector<1x128xf32>,
    } else {
    }
    return
  }
  func.func @transform_0(%arg0: i32, %arg1: i32) -> (i32, i32) {
    %c0_i32 = arith.constant 0 : i32
    return %arg0, %arg1 : i32, i32
  }
  func.func @transform_1(%arg0: i32, %arg1: i32) -> (i32, i32) {
    %c0_i32 = arith.constant 0 : i32
    %c0_i32_0 = arith.constant 0 : i32
    return %arg1, %c0_i32 : i32, i32
  }
  func.func @transform_2(%arg0: i32, %arg1: i32) -> (i32, i32) {
    %c0_i32 = arith.constant 0 : i32
    %c0_i32_0 = arith.constant 0 : i32
    return %arg0, %c0_i32 : i32, i32
  }
  func.func @transform_3(%arg0: i32, %arg1: i32) -> (i32, i32) {
    %c0_i32 = arith.constant 0 : i32
    %c0_i32_0 = arith.constant 0 : i32
    %c0_i32_1 = arith.constant 0 : i32
    return %c0_i32, %c0_i32_0 : i32, i32
  }
}

module attributes {stable_mosaic.version = 11 : i64} {
  func.func @_conv_stats_kernel(%arg0: i32, %arg1: i32, %arg2: memref<16x512xbf16, #tpu.memory_space<vmem>>, %arg3: memref<512x256xbf16, #tpu.memory_space<vmem>>, %arg4: memref<16x256xf32, #tpu.memory_space<vmem>>, %arg5: memref<2x256xf32, #tpu.memory_space<vmem>>, %arg6: memref<16x256xf32, #tpu.memory_space<vmem>>) attributes {dimension_semantics = [#tpu.dimension_semantics<arbitrary>, #tpu.dimension_semantics<arbitrary>], iteration_bounds = array<i64: 1, 4>, scalar_prefetch = 0 : i64, scratch_operands = 1 : i64, tpu.core_type = #tpu.core_type<tc>, window_params = [{transform_indices = @transform_0, window_bounds = array<i64: 16, 512>}, {transform_indices = @transform_1, window_bounds = array<i64: 512, 256>}, {transform_indices = @transform_2, window_bounds = array<i64: 16, 256>}, {pipeline_mode = #tpu.pipeline_mode<synchronous>, transform_indices = @transform_3, window_bounds = array<i64: 2, 256>}]} {
    %c0_i32 = arith.constant 0 : i32
    %0 = arith.cmpi eq, %arg0, %c0_i32 : i32
    %c0_i32_0 = arith.constant 0 : i32
    %1 = arith.cmpi eq, %arg1, %c0_i32_0 : i32
    %2 = arith.andi %0, %1 : i1
    %3 = arith.extui %2 : i1 to i32
    %c0_i32_1 = arith.constant 0 : i32
    %4 = arith.cmpi ne, %3, %c0_i32_1 : i32
    scf.if %4 {
      %cst_12 = arith.constant 0.000000e+00 : f32
      %17 = vector.broadcast %cst_12 : f32 to vector<2x256xf32>
      %c0_13 = arith.constant 0 : index
      %c0_14 = arith.constant 0 : index
      %18 = vector.load %arg5[%c0_13, %c0_14] : memref<2x256xf32, #tpu.memory_space<vmem>>, vector<2x256xf32>
      tpu.vector_store %arg5[%c0_13, %c0_14], %17 {strides = array<i32>} : memref<2x256xf32, #tpu.memory_space<vmem>>, vector<2x256xf32>,
    } else {
    }
    %c0_i32_2 = arith.constant 0 : i32
    %5 = arith.cmpi eq, %arg1, %c0_i32_2 : i32
    %6 = arith.extui %5 : i1 to i32
    %c0_i32_3 = arith.constant 0 : i32
    %7 = arith.cmpi ne, %6, %c0_i32_3 : i32
    scf.if %7 {
      %cst_12 = arith.constant 0.000000e+00 : f32
      %17 = vector.broadcast %cst_12 : f32 to vector<16x256xf32>
      %c0_13 = arith.constant 0 : index
      %c0_14 = arith.constant 0 : index
      %18 = vector.load %arg6[%c0_13, %c0_14] : memref<16x256xf32, #tpu.memory_space<vmem>>, vector<16x256xf32>
      tpu.vector_store %arg6[%c0_13, %c0_14], %17 {strides = array<i32>} : memref<16x256xf32, #tpu.memory_space<vmem>>, vector<16x256xf32>,
    } else {
    }
    %c0 = arith.constant 0 : index
    %c0_4 = arith.constant 0 : index
    %8 = vector.load %arg6[%c0, %c0_4] : memref<16x256xf32, #tpu.memory_space<vmem>>, vector<16x256xf32>
    %c0_5 = arith.constant 0 : index
    %c0_6 = arith.constant 0 : index
    %9 = vector.load %arg2[%c0_5, %c0_6] : memref<16x512xbf16, #tpu.memory_space<vmem>>, vector<16x512xbf16>
    %c0_7 = arith.constant 0 : index
    %c0_8 = arith.constant 0 : index
    %10 = vector.load %arg3[%c0_7, %c0_8] : memref<512x256xbf16, #tpu.memory_space<vmem>>, vector<512x256xbf16>
    %cst = arith.constant dense<0.000000e+00> : vector<16x256xf32>
    %11 = tpu.matmul %9, %10, %cst {dimension_numbers = #tpu.dot_dimension_numbers<[1], [0], [0], [1], [0, 0, 1, 1], [], []>} : vector<16x512xbf16>, vector<512x256xbf16>, vector<16x256xf32> -> vector<16x256xf32>
    %12 = arith.addf %8, %11 : vector<16x256xf32>
    %c0_9 = arith.constant 0 : index
    %c0_10 = arith.constant 0 : index
    %13 = vector.load %arg6[%c0_9, %c0_10] : memref<16x256xf32, #tpu.memory_space<vmem>>, vector<16x256xf32>
    tpu.vector_store %arg6[%c0_9, %c0_10], %12 {strides = array<i32>} : memref<16x256xf32, #tpu.memory_space<vmem>>, vector<16x256xf32>,
    %c3_i32 = arith.constant 3 : i32
    %14 = arith.cmpi eq, %arg1, %c3_i32 : i32
    %15 = arith.extui %14 : i1 to i32
    %c0_i32_11 = arith.constant 0 : i32
    %16 = arith.cmpi ne, %15, %c0_i32_11 : i32
    scf.if %16 {
      %c0_12 = arith.constant 0 : index
      %c0_13 = arith.constant 0 : index
      %17 = vector.load %arg6[%c0_12, %c0_13] : memref<16x256xf32, #tpu.memory_space<vmem>>, vector<16x256xf32>
      %c0_14 = arith.constant 0 : index
      %c0_15 = arith.constant 0 : index
      %18 = vector.load %arg4[%c0_14, %c0_15] : memref<16x256xf32, #tpu.memory_space<vmem>>, vector<16x256xf32>
      tpu.vector_store %arg4[%c0_14, %c0_15], %17 {strides = array<i32>} : memref<16x256xf32, #tpu.memory_space<vmem>>, vector<16x256xf32>,
      %c16_i32 = arith.constant 16 : i32
      %19 = arith.muli %arg0, %c16_i32 : i32
      %20 = tpu.iota {dimensions = array<i32: 0>} : vector<16x1xi32>
      %21 = vector.broadcast %19 : i32 to vector<16x1xi32>
      %22 = arith.addi %21, %20 : vector<16x1xi32>
      %c8_i32 = arith.constant 8 : i32
      %23 = vector.broadcast %c8_i32 : i32 to vector<16x1xi32>
      %24 = arith.cmpi slt, %22, %23 : vector<16x1xi32>
      %cst_16 = arith.constant 0.000000e+00 : f32
      %25 = vector.shape_cast %24 : vector<16x1xi1> to vector<16x1xi1>
      %26 = vector.broadcast %25 : vector<16x1xi1> to vector<16x256xi1>
      %27 = vector.broadcast %cst_16 : f32 to vector<16x256xf32>
      %28 = arith.select %26, %17, %27 : vector<16x256xi1>, vector<16x256xf32>
      %c0_17 = arith.constant 0 : index
      %c0_18 = arith.constant 0 : index
      %29 = vector.load %arg5[%c0_17, %c0_18] : memref<2x256xf32, #tpu.memory_space<vmem>>, vector<1x256xf32>
      %cst_19 = arith.constant dense<0.000000e+00> : vector<256xf32>
      %30 = vector.multi_reduction <add>, %28, %cst_19 [0] : vector<16x256xf32> to vector<256xf32>
      %31 = vector.shape_cast %30 : vector<256xf32> to vector<1x256xf32>
      %32 = arith.addf %29, %31 : vector<1x256xf32>
      %c0_20 = arith.constant 0 : index
      %c0_21 = arith.constant 0 : index
      %33 = vector.load %arg5[%c0_20, %c0_21] : memref<2x256xf32, #tpu.memory_space<vmem>>, vector<1x256xf32>
      tpu.vector_store %arg5[%c0_20, %c0_21], %32 {strides = array<i32>} : memref<2x256xf32, #tpu.memory_space<vmem>>, vector<1x256xf32>,
      %c1 = arith.constant 1 : index
      %c0_22 = arith.constant 0 : index
      %34 = vector.load %arg5[%c1, %c0_22] : memref<2x256xf32, #tpu.memory_space<vmem>>, vector<1x256xf32>
      %35 = arith.mulf %28, %28 : vector<16x256xf32>
      %cst_23 = arith.constant dense<0.000000e+00> : vector<256xf32>
      %36 = vector.multi_reduction <add>, %35, %cst_23 [0] : vector<16x256xf32> to vector<256xf32>
      %37 = vector.shape_cast %36 : vector<256xf32> to vector<1x256xf32>
      %38 = arith.addf %34, %37 : vector<1x256xf32>
      %c1_24 = arith.constant 1 : index
      %c0_25 = arith.constant 0 : index
      %39 = vector.load %arg5[%c1_24, %c0_25] : memref<2x256xf32, #tpu.memory_space<vmem>>, vector<1x256xf32>
      tpu.vector_store %arg5[%c1_24, %c0_25], %38 {strides = array<i32>} : memref<2x256xf32, #tpu.memory_space<vmem>>, vector<1x256xf32>,
    } else {
    }
    return
  }
  func.func @transform_0(%arg0: i32, %arg1: i32) -> (i32, i32) {
    %c0_i32 = arith.constant 0 : i32
    return %arg0, %arg1 : i32, i32
  }
  func.func @transform_1(%arg0: i32, %arg1: i32) -> (i32, i32) {
    %c0_i32 = arith.constant 0 : i32
    %c0_i32_0 = arith.constant 0 : i32
    return %arg1, %c0_i32 : i32, i32
  }
  func.func @transform_2(%arg0: i32, %arg1: i32) -> (i32, i32) {
    %c0_i32 = arith.constant 0 : i32
    %c0_i32_0 = arith.constant 0 : i32
    return %arg0, %c0_i32 : i32, i32
  }
  func.func @transform_3(%arg0: i32, %arg1: i32) -> (i32, i32) {
    %c0_i32 = arith.constant 0 : i32
    %c0_i32_0 = arith.constant 0 : i32
    %c0_i32_1 = arith.constant 0 : i32
    return %c0_i32, %c0_i32_0 : i32, i32
  }
}

module attributes {stable_mosaic.version = 11 : i64} {
  func.func @_bn_act_kernel(%arg0: i32, %arg1: memref<16x256xf32, #tpu.memory_space<vmem>>, %arg2: memref<2x256xf32, #tpu.memory_space<vmem>>, %arg3: memref<1x256xf32, #tpu.memory_space<vmem>>, %arg4: memref<1x256xf32, #tpu.memory_space<vmem>>, %arg5: memref<16x256xf32, #tpu.memory_space<vmem>>) attributes {dimension_semantics = [#tpu.dimension_semantics<parallel>], iteration_bounds = array<i64: 1>, scalar_prefetch = 0 : i64, scratch_operands = 0 : i64, tpu.core_type = #tpu.core_type<tc>, window_params = [{transform_indices = @transform_0, window_bounds = array<i64: 16, 256>}, {pipeline_mode = #tpu.pipeline_mode<synchronous>, transform_indices = @transform_1, window_bounds = array<i64: 2, 256>}, {pipeline_mode = #tpu.pipeline_mode<synchronous>, transform_indices = @transform_2, window_bounds = array<i64: 1, 256>}, {pipeline_mode = #tpu.pipeline_mode<synchronous>, transform_indices = @transform_3, window_bounds = array<i64: 1, 256>}, {transform_indices = @transform_4, window_bounds = array<i64: 16, 256>}]} {
    %c0 = arith.constant 0 : index
    %c0_0 = arith.constant 0 : index
    %0 = vector.load %arg2[%c0, %c0_0] : memref<2x256xf32, #tpu.memory_space<vmem>>, vector<1x256xf32>
    %cst = arith.constant 1.250000e-01 : f32
    %1 = vector.broadcast %cst : f32 to vector<1x256xf32>
    %2 = arith.mulf %0, %1 : vector<1x256xf32>
    %c1 = arith.constant 1 : index
    %c0_1 = arith.constant 0 : index
    %3 = vector.load %arg2[%c1, %c0_1] : memref<2x256xf32, #tpu.memory_space<vmem>>, vector<1x256xf32>
    %cst_2 = arith.constant 1.250000e-01 : f32
    %4 = vector.broadcast %cst_2 : f32 to vector<1x256xf32>
    %5 = arith.mulf %3, %4 : vector<1x256xf32>
    %6 = arith.mulf %2, %2 : vector<1x256xf32>
    %7 = arith.subf %5, %6 : vector<1x256xf32>
    %cst_3 = arith.constant 0.000000e+00 : f32
    %8 = vector.broadcast %cst_3 : f32 to vector<1x256xf32>
    %9 = arith.maximumf %7, %8 : vector<1x256xf32>
    %cst_4 = arith.constant 9.99999974E-6 : f32
    %10 = vector.broadcast %cst_4 : f32 to vector<1x256xf32>
    %11 = arith.addf %9, %10 : vector<1x256xf32>
    %12 = math.rsqrt %11 : vector<1x256xf32>
    %c0_5 = arith.constant 0 : index
    %c0_6 = arith.constant 0 : index
    %13 = vector.load %arg1[%c0_5, %c0_6] : memref<16x256xf32, #tpu.memory_space<vmem>>, vector<16x256xf32>
    %14 = vector.broadcast %2 : vector<1x256xf32> to vector<16x256xf32>
    %15 = arith.subf %13, %14 : vector<16x256xf32>
    %16 = vector.broadcast %12 : vector<1x256xf32> to vector<16x256xf32>
    %17 = arith.mulf %15, %16 : vector<16x256xf32>
    %c0_7 = arith.constant 0 : index
    %c0_8 = arith.constant 0 : index
    %18 = vector.load %arg3[%c0_7, %c0_8] : memref<1x256xf32, #tpu.memory_space<vmem>>, vector<1x256xf32>
    %19 = vector.broadcast %18 : vector<1x256xf32> to vector<16x256xf32>
    %20 = arith.mulf %17, %19 : vector<16x256xf32>
    %c0_9 = arith.constant 0 : index
    %c0_10 = arith.constant 0 : index
    %21 = vector.load %arg4[%c0_9, %c0_10] : memref<1x256xf32, #tpu.memory_space<vmem>>, vector<1x256xf32>
    %22 = vector.broadcast %21 : vector<1x256xf32> to vector<16x256xf32>
    %23 = arith.addf %20, %22 : vector<16x256xf32>
    %cst_11 = arith.constant 0.000000e+00 : f32
    %24 = vector.broadcast %cst_11 : f32 to vector<16x256xf32>
    %25 = arith.cmpf oge, %23, %24 : vector<16x256xf32>
    %cst_12 = arith.constant 2.000000e-01 : f32
    %26 = vector.broadcast %cst_12 : f32 to vector<16x256xf32>
    %27 = arith.mulf %26, %23 : vector<16x256xf32>
    %28 = arith.select %25, %23, %27 : vector<16x256xi1>, vector<16x256xf32>
    %c0_13 = arith.constant 0 : index
    %c0_14 = arith.constant 0 : index
    %29 = vector.load %arg5[%c0_13, %c0_14] : memref<16x256xf32, #tpu.memory_space<vmem>>, vector<16x256xf32>
    tpu.vector_store %arg5[%c0_13, %c0_14], %28 {strides = array<i32>} : memref<16x256xf32, #tpu.memory_space<vmem>>, vector<16x256xf32>,
    return
  }
  func.func @transform_0(%arg0: i32) -> (i32, i32) {
    %c0_i32 = arith.constant 0 : i32
    %c0_i32_0 = arith.constant 0 : i32
    return %arg0, %c0_i32 : i32, i32
  }
  func.func @transform_1(%arg0: i32) -> (i32, i32) {
    %c0_i32 = arith.constant 0 : i32
    %c0_i32_0 = arith.constant 0 : i32
    %c0_i32_1 = arith.constant 0 : i32
    return %c0_i32, %c0_i32_0 : i32, i32
  }
  func.func @transform_2(%arg0: i32) -> (i32, i32) {
    %c0_i32 = arith.constant 0 : i32
    %c0_i32_0 = arith.constant 0 : i32
    %c0_i32_1 = arith.constant 0 : i32
    return %c0_i32, %c0_i32_0 : i32, i32
  }
  func.func @transform_3(%arg0: i32) -> (i32, i32) {
    %c0_i32 = arith.constant 0 : i32
    %c0_i32_0 = arith.constant 0 : i32
    %c0_i32_1 = arith.constant 0 : i32
    return %c0_i32, %c0_i32_0 : i32, i32
  }
  func.func @transform_4(%arg0: i32) -> (i32, i32) {
    %c0_i32 = arith.constant 0 : i32
    %c0_i32_0 = arith.constant 0 : i32
    return %arg0, %c0_i32 : i32, i32
  }
}

module attributes {stable_mosaic.version = 11 : i64} {
  func.func @_conv_bias_act_kernel(%arg0: i32, %arg1: i32, %arg2: memref<16x512xbf16, #tpu.memory_space<vmem>>, %arg3: memref<512x128xbf16, #tpu.memory_space<vmem>>, %arg4: memref<1x128xf32, #tpu.memory_space<vmem>>, %arg5: memref<16x128xf32, #tpu.memory_space<vmem>>, %arg6: memref<16x128xf32, #tpu.memory_space<vmem>>) attributes {dimension_semantics = [#tpu.dimension_semantics<parallel>, #tpu.dimension_semantics<arbitrary>], iteration_bounds = array<i64: 1, 8>, scalar_prefetch = 0 : i64, scratch_operands = 1 : i64, tpu.core_type = #tpu.core_type<tc>, window_params = [{transform_indices = @transform_0, window_bounds = array<i64: 16, 512>}, {transform_indices = @transform_1, window_bounds = array<i64: 512, 128>}, {pipeline_mode = #tpu.pipeline_mode<synchronous>, transform_indices = @transform_2, window_bounds = array<i64: 1, 128>}, {transform_indices = @transform_3, window_bounds = array<i64: 16, 128>}]} {
    %c0_i32 = arith.constant 0 : i32
    %0 = arith.cmpi eq, %arg1, %c0_i32 : i32
    %1 = arith.extui %0 : i1 to i32
    %c0_i32_0 = arith.constant 0 : i32
    %2 = arith.cmpi ne, %1, %c0_i32_0 : i32
    scf.if %2 {
      %cst_9 = arith.constant 0.000000e+00 : f32
      %12 = vector.broadcast %cst_9 : f32 to vector<16x128xf32>
      %c0_10 = arith.constant 0 : index
      %c0_11 = arith.constant 0 : index
      %13 = vector.load %arg6[%c0_10, %c0_11] : memref<16x128xf32, #tpu.memory_space<vmem>>, vector<16x128xf32>
      tpu.vector_store %arg6[%c0_10, %c0_11], %12 {strides = array<i32>} : memref<16x128xf32, #tpu.memory_space<vmem>>, vector<16x128xf32>,
    } else {
    }
    %c0 = arith.constant 0 : index
    %c0_1 = arith.constant 0 : index
    %3 = vector.load %arg6[%c0, %c0_1] : memref<16x128xf32, #tpu.memory_space<vmem>>, vector<16x128xf32>
    %c0_2 = arith.constant 0 : index
    %c0_3 = arith.constant 0 : index
    %4 = vector.load %arg2[%c0_2, %c0_3] : memref<16x512xbf16, #tpu.memory_space<vmem>>, vector<16x512xbf16>
    %c0_4 = arith.constant 0 : index
    %c0_5 = arith.constant 0 : index
    %5 = vector.load %arg3[%c0_4, %c0_5] : memref<512x128xbf16, #tpu.memory_space<vmem>>, vector<512x128xbf16>
    %cst = arith.constant dense<0.000000e+00> : vector<16x128xf32>
    %6 = tpu.matmul %4, %5, %cst {dimension_numbers = #tpu.dot_dimension_numbers<[1], [0], [0], [1], [0, 0, 1, 1], [], []>} : vector<16x512xbf16>, vector<512x128xbf16>, vector<16x128xf32> -> vector<16x128xf32>
    %7 = arith.addf %3, %6 : vector<16x128xf32>
    %c0_6 = arith.constant 0 : index
    %c0_7 = arith.constant 0 : index
    %8 = vector.load %arg6[%c0_6, %c0_7] : memref<16x128xf32, #tpu.memory_space<vmem>>, vector<16x128xf32>
    tpu.vector_store %arg6[%c0_6, %c0_7], %7 {strides = array<i32>} : memref<16x128xf32, #tpu.memory_space<vmem>>, vector<16x128xf32>,
    %c7_i32 = arith.constant 7 : i32
    %9 = arith.cmpi eq, %arg1, %c7_i32 : i32
    %10 = arith.extui %9 : i1 to i32
    %c0_i32_8 = arith.constant 0 : i32
    %11 = arith.cmpi ne, %10, %c0_i32_8 : i32
    scf.if %11 {
      %c0_9 = arith.constant 0 : index
      %c0_10 = arith.constant 0 : index
      %12 = vector.load %arg6[%c0_9, %c0_10] : memref<16x128xf32, #tpu.memory_space<vmem>>, vector<16x128xf32>
      %c0_11 = arith.constant 0 : index
      %c0_12 = arith.constant 0 : index
      %13 = vector.load %arg4[%c0_11, %c0_12] : memref<1x128xf32, #tpu.memory_space<vmem>>, vector<1x128xf32>
      %14 = vector.broadcast %13 : vector<1x128xf32> to vector<16x128xf32>
      %15 = arith.addf %12, %14 : vector<16x128xf32>
      %c0_13 = arith.constant 0 : index
      %c0_14 = arith.constant 0 : index
      %16 = vector.load %arg5[%c0_13, %c0_14] : memref<16x128xf32, #tpu.memory_space<vmem>>, vector<16x128xf32>
      tpu.vector_store %arg5[%c0_13, %c0_14], %15 {strides = array<i32>} : memref<16x128xf32, #tpu.memory_space<vmem>>, vector<16x128xf32>,
    } else {
    }
    return
  }
  func.func @transform_0(%arg0: i32, %arg1: i32) -> (i32, i32) {
    %c0_i32 = arith.constant 0 : i32
    return %arg0, %arg1 : i32, i32
  }
  func.func @transform_1(%arg0: i32, %arg1: i32) -> (i32, i32) {
    %c0_i32 = arith.constant 0 : i32
    %c0_i32_0 = arith.constant 0 : i32
    return %arg1, %c0_i32 : i32, i32
  }
  func.func @transform_2(%arg0: i32, %arg1: i32) -> (i32, i32) {
    %c0_i32 = arith.constant 0 : i32
    %c0_i32_0 = arith.constant 0 : i32
    %c0_i32_1 = arith.constant 0 : i32
    return %c0_i32, %c0_i32_0 : i32, i32
  }
  func.func @transform_3(%arg0: i32, %arg1: i32) -> (i32, i32) {
    %c0_i32 = arith.constant 0 : i32
    %c0_i32_0 = arith.constant 0 : i32
    return %arg0, %c0_i32 : i32, i32
  }
}

</mosaic_0001>

<bundles_post_ra>
// kernel: discriminator_forward.6
= control target key start
LH: loop header
LB: loop body
LE: loop exit
PB: predicated region body
PF: predicated region fallthrough
CT: control target
= control target key end

     0   :  { %s608_s1 = inlined_call_operand.vmem [shape: bf16[128,128], index: 1, kind: input, shape index: {}]   ;;  %s609_s2 = inlined_call_operand.vmem [shape: f32[1,128], index: 2, kind: input, shape index: {}]   ;;  %s610_s0 = inlined_call_operand.vmem [shape: bf16[128,128], index: 0, kind: input, shape index: {}]   ;;  %s611_s3 = inlined_call_operand.vmem [shape: f32[128,128], index: 3, kind: output, shape index: {}]  }
   0x1   :  { %v445_v0 = vld [vmem:[%s608_s1 + $0x38] sm:$0xff]  ;;  %v444_v1 = vld [vmem:[%s608_s1 + $0x30] sm:$0xff]  ;;  %v443_v2 = vld [vmem:[%s608_s1 + $0x28] sm:$0xff] }
   0x2   :  { %178 = vmatpush.bf16.msra.mxu0 %v445_v0  ;;  %446 = vmatpush.bf16.msra.mxu1 %v445_v0  ;;  %v442_v3 = vld [vmem:[%s608_s1 + $0x20] sm:$0xff]  ;;  %v441_v4 = vld [vmem:[%s608_s1 + $0x18] sm:$0xff]  ;;  %v440_v5 = vld [vmem:[%s608_s1 + $0x10] sm:$0xff] }
   0x3   :  { %447 = vmatpush.bf16.msra.mxu2 %v445_v0  ;;  %448 = vmatpush.bf16.msra.mxu3 %v445_v0  ;;  %v439_v6 = vld [vmem:[%s608_s1 + $0x8] sm:$0xff]  ;;  %v438_v7 = vld [vmem:[%s608_s1] sm:$0xff]  ;;  %v432_v9 = vld [vmem:[%s610_s0 + $0x10] sm:$0xff] }
   0x4   :  { %v430_v8 = vld [vmem:[%s610_s0] sm:$0xff]  ;;  %v436_v11 = vld [vmem:[%s610_s0 + $0x30] sm:$0xff]  ;;  %v431_v12 = vld [vmem:[%s610_s0 + $0x8] sm:$0xff] }
   0x5   :  { %v434_v10 = vld [vmem:[%s610_s0 + $0x20] sm:$0xff]  ;;  %v433_v13 = vld [vmem:[%s610_s0 + $0x18] sm:$0xff]  ;;  %v435_v14 = vld [vmem:[%s610_s0 + $0x28] sm:$0xff] }
   0x6   :  { %179 = vmatpush.bf16.msra.mxu0 %v444_v1  ;;  %449 = vmatpush.bf16.msra.mxu1 %v444_v1  ;;  %v437_v15 = vld [vmem:[%s610_s0 + $0x38] sm:$0xff]  ;;  %v542_v16 = vld [vmem:[%s609_s2] ss:$0 sm:$0xff] }
   0x7   :  { %450 = vmatpush.bf16.msra.mxu2 %v444_v1  ;;  %451 = vmatpush.bf16.msra.mxu3 %v444_v1 }
   0xa   :  { %180 = vmatpush.bf16.msra.mxu0 %v443_v2  ;;  %452 = vmatpush.bf16.msra.mxu1 %v443_v2 }
   0xb   :  { %453 = vmatpush.bf16.msra.mxu2 %v443_v2  ;;  %454 = vmatpush.bf16.msra.mxu3 %v443_v2 }
   0xe   :  { %181 = vmatpush.bf16.msra.mxu0 %v442_v3  ;;  %455 = vmatpush.bf16.msra.mxu1 %v442_v3 }
   0xf   :  { %456 = vmatpush.bf16.msra.mxu2 %v442_v3  ;;  %457 = vmatpush.bf16.msra.mxu3 %v442_v3 }
  0x12   :  { %182 = vmatpush.bf16.msra.mxu0 %v441_v4  ;;  %458 = vmatpush.bf16.msra.mxu1 %v441_v4 }
  0x13   :  { %459 = vmatpush.bf16.msra.mxu2 %v441_v4  ;;  %460 = vmatpush.bf16.msra.mxu3 %v441_v4 }
  0x16   :  { %183 = vmatpush.bf16.msra.mxu0 %v440_v5  ;;  %461 = vmatpush.bf16.msra.mxu1 %v440_v5 }
  0x17   :  { %462 = vmatpush.bf16.msra.mxu2 %v440_v5  ;;  %463 = vmatpush.bf16.msra.mxu3 %v440_v5 }
  0x1a   :  { %184 = vmatpush.bf16.msra.mxu0 %v439_v6  ;;  %464 = vmatpush.bf16.msra.mxu1 %v439_v6 }
  0x1b   :  { %465 = vmatpush.bf16.msra.mxu2 %v439_v6  ;;  %466 = vmatpush.bf16.msra.mxu3 %v439_v6 }
  0x1e   :  { %185 = vmatpush.bf16.msra.mxu0 %v438_v7  ;;  %467 = vmatpush.bf16.msra.mxu1 %v438_v7 }
  0x1f   :  { %468 = vmatpush.bf16.msra.mxu2 %v438_v7  ;;  %469 = vmatpush.bf16.msra.mxu3 %v438_v7 }
  0x21   :  { %186 = vmatmul.bf16.vlgmr.msra.gmra.mxu0 %v430_v8  ;;  %196 = vmatmul.bf16.vlgmr.msra.gmra.mxu1 %v432_v9 }
  0x22   :  { %206 = vmatmul.bf16.vlgmr.msra.gmra.mxu2 %v434_v10  ;;  %216 = vmatmul.bf16.vlgmr.msra.gmra.mxu3 %v436_v11 }
  0x31   :  { %191 = vmatmul.bf16.gmra.mxu0 %v431_v12  ;;  %201 = vmatmul.bf16.gmra.mxu1 %v433_v13 }
  0x32   :  { %211 = vmatmul.bf16.gmra.mxu2 %v435_v14  ;;  %221 = vmatmul.bf16.gmra.mxu3 %v437_v15 }
  0x9e   :  { %v187_v17 = vpop.f32.mrf.mxu0  ;;  %v197_v18 = vpop.f32.mrf.mxu1 }
  0x9f   :  { %v282_v19 = vadd.f32 %v542_v16, %v187_v17  ;;  %v286_v20 = vadd.f32 %v542_v16, %v197_v18 }
  0xa1   :  { %vm298_vm0 = vcmp.ge.f32.partialorder %v282_v19, 0.0  ;;  %v314_v21 = vmul.f32 0.2, %v282_v19  ;;  %vm302_vm1 = vcmp.ge.f32.partialorder %v286_v20, 0.0  ;;  %v318_v22 = vmul.f32 0.2, %v286_v20 }
  0xa3   :  { %v330_v23 = vsel %vm298_vm0, %v282_v19, %v314_v21  ;;  %v334_v24 = vsel %vm302_vm1, %v286_v20, %v318_v22 }
  0xa4   :  { %346 = vst [vmem:[%s611_s3] sm:$0xff] %v330_v23 }
  0xa5   :  { %350 = vst [vmem:[%s611_s3 + $0x20] sm:$0xff] %v334_v24  ;;  %v207_v25 = vpop.f32.mrf.mxu2  ;;  %v217_v26 = vpop.f32.mrf.mxu3 }
  0xa6   :  { %v290_v27 = vadd.f32 %v542_v16, %v207_v25  ;;  %v294_v28 = vadd.f32 %v542_v16, %v217_v26  ;;  %v189_v29 = vpop.f32.mrf.mxu0  ;;  %v199_v30 = vpop.f32.mrf.mxu1 }
  0xa7   :  { %v283_v31 = vadd.f32 %v542_v16, %v189_v29  ;;  %v287_v32 = vadd.f32 %v542_v16, %v199_v30 }
  0xa8   :  { %vm306_vm2 = vcmp.ge.f32.partialorder %v290_v27, 0.0  ;;  %v322_v33 = vmul.f32 0.2, %v290_v27  ;;  %vm310_vm3 = vcmp.ge.f32.partialorder %v294_v28, 0.0  ;;  %v326_v34 = vmul.f32 0.2, %v294_v28 }
  0xa9   :  { %vm299_vm4 = vcmp.ge.f32.partialorder %v283_v31, 0.0  ;;  %v315_v35 = vmul.f32 0.2, %v283_v31  ;;  %vm303_vm5 = vcmp.ge.f32.partialorder %v287_v32, 0.0  ;;  %v319_v36 = vmul.f32 0.2, %v287_v32 }
  0xaa   :  { %v338_v37 = vsel %vm306_vm2, %v290_v27, %v322_v33  ;;  %v342_v38 = vsel %vm310_vm3, %v294_v28, %v326_v34 }
  0xab   :  { %354 = vst [vmem:[%s611_s3 + $0x40] sm:$0xff] %v338_v37  ;;  %v331_v39 = vsel %vm299_vm4, %v283_v31, %v315_v35  ;;  %v335_v40 = vsel %vm303_vm5, %v287_v32, %v319_v36 }
  0xac   :  { %358 = vst [vmem:[%s611_s3 + $0x60] sm:$0xff] %v342_v38 }
  0xad   :  { %347 = vst [vmem:[%s611_s3 + $0x8] sm:$0xff] %v331_v39  ;;  %v209_v41 = vpop.f32.mrf.mxu2  ;;  %v219_v42 = vpop.f32.mrf.mxu3 }
  0xae   :  { %351 = vst [vmem:[%s611_s3 + $0x28] sm:$0xff] %v335_v40  ;;  %v291_v43 = vadd.f32 %v542_v16, %v209_v41  ;;  %v295_v44 = vadd.f32 %v542_v16, %v219_v42  ;;  %v192_v45 = vpop.f32.mrf.mxu0  ;;  %v202_v46 = vpop.f32.mrf.mxu1 }
  0xaf   :  { %v284_v47 = vadd.f32 %v542_v16, %v192_v45  ;;  %v288_v48 = vadd.f32 %v542_v16, %v202_v46 }
  0xb0   :  { %vm307_vm6 = vcmp.ge.f32.partialorder %v291_v43, 0.0  ;;  %v323_v49 = vmul.f32 0.2, %v291_v43  ;;  %vm311_vm7 = vcmp.ge.f32.partialorder %v295_v44, 0.0  ;;  %v327_v50 = vmul.f32 0.2, %v295_v44 }
  0xb1   :  { %vm300_vm8 = vcmp.ge.f32.partialorder %v284_v47, 0.0  ;;  %v316_v51 = vmul.f32 0.2, %v284_v47  ;;  %vm304_vm9 = vcmp.ge.f32.partialorder %v288_v48, 0.0  ;;  %v320_v52 = vmul.f32 0.2, %v288_v48 }
  0xb2   :  { %v339_v53 = vsel %vm307_vm6, %v291_v43, %v323_v49  ;;  %v343_v54 = vsel %vm311_vm7, %v295_v44, %v327_v50 }
  0xb3   :  { %355 = vst [vmem:[%s611_s3 + $0x48] sm:$0xff] %v339_v53  ;;  %v332_v55 = vsel %vm300_vm8, %v284_v47, %v316_v51  ;;  %v336_v56 = vsel %vm304_vm9, %v288_v48, %v320_v52 }
  0xb4   :  { %359 = vst [vmem:[%s611_s3 + $0x68] sm:$0xff] %v343_v54 }
  0xb5   :  { %348 = vst [vmem:[%s611_s3 + $0x10] sm:$0xff] %v332_v55  ;;  %v212_v57 = vpop.f32.mrf.mxu2  ;;  %v222_v58 = vpop.f32.mrf.mxu3 }
  0xb6   :  { %352 = vst [vmem:[%s611_s3 + $0x30] sm:$0xff] %v336_v56  ;;  %v292_v59 = vadd.f32 %v542_v16, %v212_v57  ;;  %v296_v60 = vadd.f32 %v542_v16, %v222_v58  ;;  %v194_v61 = vpop.f32.mrf.mxu0  ;;  %v204_v62 = vpop.f32.mrf.mxu1 }
  0xb7   :  { %v285_v63 = vadd.f32 %v542_v16, %v194_v61  ;;  %v289_v0 = vadd.f32 %v542_v16, %v204_v62 }
  0xb8   :  { %vm308_vm10 = vcmp.ge.f32.partialorder %v292_v59, 0.0  ;;  %v324_v1 = vmul.f32 0.2, %v292_v59  ;;  %vm312_vm11 = vcmp.ge.f32.partialorder %v296_v60, 0.0  ;;  %v328_v2 = vmul.f32 0.2, %v296_v60 }
  0xb9   :  { %vm301_vm12 = vcmp.ge.f32.partialorder %v285_v63, 0.0  ;;  %v317_v3 = vmul.f32 0.2, %v285_v63  ;;  %vm305_vm13 = vcmp.ge.f32.partialorder %v289_v0, 0.0  ;;  %v321_v4 = vmul.f32 0.2, %v289_v0 }
  0xba   :  { %v340_v5 = vsel %vm308_vm10, %v292_v59, %v324_v1  ;;  %v344_v6 = vsel %vm312_vm11, %v296_v60, %v328_v2 }
  0xbb   :  { %356 = vst [vmem:[%s611_s3 + $0x50] sm:$0xff] %v340_v5  ;;  %v333_v7 = vsel %vm301_vm12, %v285_v63, %v317_v3  ;;  %v337_v8 = vsel %vm305_vm13, %v289_v0, %v321_v4 }
  0xbc   :  { %360 = vst [vmem:[%s611_s3 + $0x70] sm:$0xff] %v344_v6 }
  0xbd   :  { %349 = vst [vmem:[%s611_s3 + $0x18] sm:$0xff] %v333_v7  ;;  %v214_v9 = vpop.f32.mrf.mxu2  ;;  %v224_v10 = vpop.f32.mrf.mxu3 }
  0xbe   :  { %353 = vst [vmem:[%s611_s3 + $0x38] sm:$0xff] %v337_v8  ;;  %v293_v11 = vadd.f32 %v542_v16, %v214_v9  ;;  %v297_v12 = vadd.f32 %v542_v16, %v224_v10 }
  0xc0   :  { %vm309_vm14 = vcmp.ge.f32.partialorder %v293_v11, 0.0  ;;  %v325_v13 = vmul.f32 0.2, %v293_v11  ;;  %vm313_vm15 = vcmp.ge.f32.partialorder %v297_v12, 0.0  ;;  %v329_v14 = vmul.f32 0.2, %v297_v12 }
  0xc2   :  { %v341_v15 = vsel %vm309_vm14, %v293_v11, %v325_v13  ;;  %v345_v17 = vsel %vm313_vm15, %v297_v12, %v329_v14 }
  0xc3   :  { %357 = vst [vmem:[%s611_s3 + $0x58] sm:$0xff] %v341_v15 }
  0xc4   :  { %361 = vst [vmem:[%s611_s3 + $0x78] sm:$0xff] %v345_v17 }

// kernel: discriminator_forward.8
= control target key start
LH: loop header
LB: loop body
LE: loop exit
PB: predicated region body
PF: predicated region fallthrough
CT: control target
= control target key end

     0   :  { %s150_s1 = inlined_call_operand.vmem [shape: f32[2,128], index: 1, kind: input, shape index: {}]   ;;  %s151_s2 = inlined_call_operand.vmem [shape: f32[1,128], index: 2, kind: input, shape index: {}]   ;;  %s152_s3 = inlined_call_operand.vmem [shape: f32[1,128], index: 3, kind: input, shape index: {}]   ;;  %s153_s0 = inlined_call_operand.vmem [shape: f32[32,128], index: 0, kind: input, shape index: {}]   ;;  %s154_s4 = inlined_call_operand.vmem [shape: f32[32,128], index: 4, kind: output, shape index: {}]  }
   0x1   :  { %v17_v0 = vld [vmem:[%s150_s1] sm:$0x1]  ;;  %v19_v1 = vld [vmem:[%s150_s1 + $0x1] sm:$0x1]  ;;  %v36_v15 = vld [vmem:[%s153_s0 + $0x8] sm:$0xff] }
   0x2   :  { %v18_v2 = vmul.f32 0.03125, %v17_v0  ;;  %v20_v3 = vmul.f32 0.03125, %v19_v1  ;;  %v35_v12 = vld [vmem:[%s153_s0] sm:$0xff]  ;;  %v37_v16 = vld [vmem:[%s153_s0 + $0x10] sm:$0xff]  ;;  %v38_v17 = vld [vmem:[%s153_s0 + $0x18] sm:$0xff] }
   0x3   :  { %v85_v25 = vld [vmem:[%s151_s2] ss:$0 sm:$0xff] }
   0x4   :  { %v21_v4 = vmul.f32 %v18_v2, %v18_v2  ;;  %v39_v13 = vperm.slane %v18_v2, 0  ;;  %v86_v27 = vld [vmem:[%s152_s3] ss:$0 sm:$0xff] }
   0x6   :  { %v22_v5 = vsub.f32 %v20_v3, %v21_v4  ;;  %v40_v19 = vsub.f32 %v35_v12, %v39_v13  ;;  %v41_v20 = vsub.f32 %v36_v15, %v39_v13  ;;  %v42_v21 = vsub.f32 %v37_v16, %v39_v13 }
   0x7   :  { %v43_v22 = vsub.f32 %v38_v17, %v39_v13 }
   0x8   :  { %v23_v6 = vmax.f32 %v22_v5, 0.0 }
   0xa   :  { %v24_v7 = vadd.f32 1e-05, %v23_v6 }
   0xc   :  { %87 = vrsqrt.f32 %v24_v7  ;;  %vm31_vm0 = vweird.f32 %v24_v7 }
  0x12   :  { %v88_v8 = vpop.eup %87 }
  0x13   :  { %v26_v9 = vmul.f32 %v88_v8, %v24_v7  ;;  %vm32_vm1 = vweird.f32 %v88_v8 }
  0x14   :  { %vm33_vm2 = vmor %vm31_vm0, %vm32_vm1 }
  0x15   :  { %v27_v10 = vmul.f32 %v88_v8, %v26_v9 }
  0x17   :  { %v28_v11 = vmul.f32 0.5, %v27_v10 }
  0x19   :  { %v29_v14 = vsub.f32 1.5, %v28_v11 }
  0x1b   :  { %v30_v18 = vmul.f32 %v88_v8, %v29_v14 }
  0x1d   :  { %v34_v23 = vsel %vm33_vm2, %v88_v8, %v30_v18 }
  0x1e   :  { %v44_v24 = vperm.slane %v34_v23, 0 }
  0x20   :  { %v45_v26 = vmul.f32 %v44_v24, %v40_v19  ;;  %v46_v28 = vmul.f32 %v44_v24, %v41_v20  ;;  %v47_v29 = vmul.f32 %v44_v24, %v42_v21  ;;  %v48_v30 = vmul.f32 %v44_v24, %v43_v22 }
  0x22   :  { %v53_v31 = vmul.f32 %v85_v25, %v45_v26  ;;  %v54_v32 = vmul.f32 %v85_v25, %v46_v28  ;;  %v55_v33 = vmul.f32 %v85_v25, %v47_v29  ;;  %v56_v34 = vmul.f32 %v85_v25, %v48_v30 }
  0x24   :  { %v61_v35 = vadd.f32 %v86_v27, %v53_v31  ;;  %v62_v36 = vadd.f32 %v86_v27, %v54_v32  ;;  %v63_v37 = vadd.f32 %v86_v27, %v55_v33  ;;  %v64_v38 = vadd.f32 %v86_v27, %v56_v34 }
  0x26   :  { %vm65_vm3 = vcmp.ge.f32.partialorder %v61_v35, 0.0  ;;  %v69_v39 = vmul.f32 0.2, %v61_v35  ;;  %vm66_vm4 = vcmp.ge.f32.partialorder %v62_v36, 0.0  ;;  %v70_v40 = vmul.f32 0.2, %v62_v36 }
  0x27   :  { %vm67_vm5 = vcmp.ge.f32.partialorder %v63_v37, 0.0  ;;  %v71_v41 = vmul.f32 0.2, %v63_v37  ;;  %vm68_vm6 = vcmp.ge.f32.partialorder %v64_v38, 0.0  ;;  %v72_v42 = vmul.f32 0.2, %v64_v38 }
  0x28   :  { %v73_v43 = vsel %vm65_vm3, %v61_v35, %v69_v39  ;;  %v74_v44 = vsel %vm66_vm4, %v62_v36, %v70_v40 }
  0x29   :  { %77 = vst [vmem:[%s154_s4] sm:$0xff] %v73_v43  ;;  %v75_v45 = vsel %vm67_vm5, %v63_v37, %v71_v41  ;;  %v76_v46 = vsel %vm68_vm6, %v64_v38, %v72_v42 }
  0x2a   :  { %78 = vst [vmem:[%s154_s4 + $0x8] sm:$0xff] %v74_v44 }
  0x2b   :  { %79 = vst [vmem:[%s154_s4 + $0x10] sm:$0xff] %v75_v45 }
  0x2c   :  { %80 = vst [vmem:[%s154_s4 + $0x18] sm:$0xff] %v76_v46 }

// kernel: discriminator_forward.7
= control target key start
LH: loop header
LB: loop body
LE: loop exit
PB: predicated region body
PF: predicated region fallthrough
CT: control target
= control target key end

     0   :  { %s1130_s12 = smov 0   ;;  %s1132_s13 = smov 0   ;;  %s1277_s0 = inlined_call_operand.vmem [shape: bf16[32,1024], index: 0, kind: input, shape index: {}]   ;;  %s1278_s1 = inlined_call_operand.vmem [shape: bf16[1024,128], index: 1, kind: input, shape index: {}]   ;;  %s1279_s2 = inlined_call_operand.vmem [shape: f32[32,128], index: 2, kind: output, shape index: {0}]   ;;  %s1280_s3 = inlined_call_operand.vmem [shape: f32[2,128], index: 3, kind: output, shape index: {1}]  }
   0x1   :  { %s1134_s14 = smov 0   ;;  %s1136_s15 = smov 0  }
   0x2   :  { %s1138_s16 = smov 0  }
   0x3 LB: > { %s23_s17 = sadd.s32 1, %s1102_s15  ;;  %p42_p1 = scmp.ne.s32.totalorder %s1094_s13, %s1090_s12  ;;  %s1106_s16 = sphi %s1138_s16, %s14_s16   ;;  %s1102_s15 = sphi %s1136_s15, %s1284_s15   ;;  %s1098_s14 = sphi %s1134_s14, %s1283_s14   ;;  %s1094_s13 = sphi %s1132_s13, %s1282_s13   ;;  %s1090_s12 = sphi %s1130_s12, %s1281_s12  }
   0x4   : > { %p24_p0 = scmp.ge.s32.totalorder %s23_s17, 2  ;;  %p43_p2 = scmp.eq.s32.totalorder %s1106_s16, 0 }
   0x5   : > { %s35_s19 = sadd.s32 1, %s1094_s13  ;;  %p809_p5 = scmp.ge.s32.totalorder %s1106_s16, 2 }
   0x6   : > { %s1286_s17 = smov (%p24_p0, %s23_s17), 0  ;;  %p44_p3 = por %p43_p2, %p42_p1 }
   0x7   : > { %s31_s18 = ssub.s32 %s1102_s15, %s1286_s17  ;;  %141 = sbr.rel (%p809_p5) target bundleno = 24 (0x18), region = 16 }
   0x8   : > { %p33_p4 = scmp.eq.s32.totalorder %s31_s18, 0 }
   0xa   : > { %s1165_s20 = scalar_select %p33_p4, %s1094_s13, %s35_s19  }
   0xc   : > { %144 = sbr.rel (!%p44_p3) target bundleno = 24 (0x18), region = 20  ;;  %s146_s21 = sand.u32 (%p44_p3), 1, %s1094_s13  }
   0xd   : > { %s984_s22 = sshll.u32 (%p44_p3), %s1102_s15, 4  ;;  %s810_s23 = sshll.u32 (%p44_p3), %s146_s21, 6 }
   0xe   : > { %s154_s26 = scalar_lea.vmem (%p44_p3), %s1277_s0, %s984_s22  ;;  %s148_s27 = scalar_lea.vmem (%p44_p3), [#allocation3], %s810_s23 }
   0xf   : > { %v167_v0 = vld [vmem:[%s154_s26] sm:$0xff] (%p44_p3)  ;;  %v169_v1 = vld [vmem:[%s154_s26 + $0x8] sm:$0xff] (%p44_p3) }
  0x10   : > { %v171_v2 = vld [vmem:[%s154_s26 + $0x20] sm:$0xff] (%p44_p3)  ;;  %168 = vst [vmem:[%s148_s27] sm:$0xff] (%p44_p3), %v167_v0  ;;  %v173_v3 = vld [vmem:[%s154_s26 + $0x28] sm:$0xff] (%p44_p3) }
  0x11   : > { %170 = vst [vmem:[%s148_s27 + $0x8] sm:$0xff] %v169_v1  ;;  %v175_v4 = vld [vmem:[%s154_s26 + $0x40] sm:$0xff]  ;;  %v177_v5 = vld [vmem:[%s154_s26 + $0x48] sm:$0xff] }
  0x12   : > { %172 = vst [vmem:[%s148_s27 + $0x10] sm:$0xff] %v171_v2  ;;  %v179_v6 = vld [vmem:[%s154_s26 + $0x60] sm:$0xff]  ;;  %v181_v7 = vld [vmem:[%s154_s26 + $0x68] sm:$0xff] }
  0x13   : > { %174 = vst [vmem:[%s148_s27 + $0x18] sm:$0xff] %v173_v3 }
  0x14   : > { %176 = vst [vmem:[%s148_s27 + $0x20] sm:$0xff] %v175_v4 }
  0x15   : > { %178 = vst [vmem:[%s148_s27 + $0x28] sm:$0xff] %v177_v5 }
  0x16   : > { %180 = vst [vmem:[%s148_s27 + $0x30] sm:$0xff] %v179_v6 }
  0x17   : > { %182 = vst [vmem:[%s148_s27 + $0x38] sm:$0xff] %v181_v7 }
  0x18 PF: > { %p813_p6 = scmp.ge.s32.totalorder %s1106_s16, 1  ;;  %p196_p7 = scmp.lt.s32.totalorder %s1106_s16, 3 }
  0x1a   : > { %p197_p8 = pnand %p813_p6, %p196_p7 }
  0x1b   : > { %s203_s28 = sand.u32 (!%p197_p8), 1, %s1090_s12   ;;  %s815_s29 = sshll.u32 (!%p197_p8), %s1098_s14, 6 }
  0x1c   : > { %200 = sbr.rel (%p197_p8) target bundleno = 273 (0x111), region = 47  ;;  %s814_s30 = sshll.u32 (!%p197_p8), %s203_s28, 6 }
  0x1d   : > { %p234_p9 = scmp.lt.s32.totalorder (!%p197_p8), %s815_s29, 127  ;;  %p246_p10 = scmp.eq.s32.totalorder (!%p197_p8), %s1098_s14, 0 }
  0x1e   : > { %s1183_s8 = scalar_lea.vmem (!%p197_p8), [#allocation3], %s814_s30 }
  0x21   : > { %s1288_s29 = smov (!%p234_p9, %s815_s29), 127  ;;  %250 = sbr.rel (!%p246_p10) target bundleno = 38 (0x26), region = 55  ;;  %v1108_v8 = vmov (%p246_p10), 0.0  }
  0x22   : > { %s816_s4 = sshll.u32 %s1288_s29, 2  ;;  %251 = vst [vmem:[%s1280_s3] sm:$0x3] (%p246_p10), %v1108_v8 }
  0x23   : > { %s1181_s7 = scalar_lea.vmem %s1278_s1, %s816_s4 }
  0x26 PF: > { %p818_p11 = scmp.ne.s32.totalorder %s1098_s14, 0 }
  0x28   : > { %254 = sbr.rel (%p818_p11) target bundleno = 50 (0x32), region = 59 }
  0x2d   : > { %v1109_v9 = vmov 0.0  }
  0x2e   : > { %255 = vst [vmem:[#allocation2 + $0x10] sm:$0xff] %v1109_v9 }
  0x2f   : > { %256 = vst [vmem:[#allocation2] sm:$0xff] %v1109_v9 }
  0x30   : > { %257 = vst [vmem:[#allocation2 + $0x18] sm:$0xff] %v1109_v9 }
  0x31   : > { %258 = vst [vmem:[#allocation2 + $0x8] sm:$0xff] %v1109_v9 }
  0x32 PF: > { %v1001_v10 = vld [vmem:[%s1181_s7 + $0x38] sm:$0xff]  ;;  %v1000_v14 = vld [vmem:[%s1181_s7 + $0x30] sm:$0xff]  ;;  %v999_v18 = vld [vmem:[%s1181_s7 + $0x28] sm:$0xff]  ;;  %p979_p12 = scmp.ne.s32.totalorder %s1098_s14, 1 }
  0x33   : > { %v1009_v11 = vld [vmem:[%s1181_s7 + $0x78] sm:$0xff]  ;;  %567 = vmatpush.bf16.msra.mxu0 %v1001_v10  ;;  %v1008_v15 = vld [vmem:[%s1181_s7 + $0x70] sm:$0xff]  ;;  %v1007_v19 = vld [vmem:[%s1181_s7 + $0x68] sm:$0xff] }
  0x34   : > { %v1017_v12 = vld [vmem:[%s1181_s7 + $0xb8] sm:$0xff]  ;;  %586 = vmatpush.bf16.msra.mxu1 %v1009_v11  ;;  %v1016_v16 = vld [vmem:[%s1181_s7 + $0xb0] sm:$0xff]  ;;  %v1015_v20 = vld [vmem:[%s1181_s7 + $0xa8] sm:$0xff] }
  0x35   : > { %v1025_v13 = vld [vmem:[%s1181_s7 + $0xf8] sm:$0xff]  ;;  %605 = vmatpush.bf16.msra.mxu2 %v1017_v12  ;;  %v1024_v17 = vld [vmem:[%s1181_s7 + $0xf0] sm:$0xff]  ;;  %v1023_v21 = vld [vmem:[%s1181_s7 + $0xe8] sm:$0xff] }
  0x36   : > { %624 = vmatpush.bf16.msra.mxu3 %v1025_v13  ;;  %v998_v22 = vld [vmem:[%s1181_s7 + $0x20] sm:$0xff]  ;;  %v997_v26 = vld [vmem:[%s1181_s7 + $0x18] sm:$0xff]  ;;  %v996_v30 = vld [vmem:[%s1181_s7 + $0x10] sm:$0xff] }
  0x37   : > { %568 = vmatpush.bf16.msra.mxu0 %v1000_v14  ;;  %v1006_v23 = vld [vmem:[%s1181_s7 + $0x60] sm:$0xff]  ;;  %v1005_v27 = vld [vmem:[%s1181_s7 + $0x58] sm:$0xff]  ;;  %v1004_v31 = vld [vmem:[%s1181_s7 + $0x50] sm:$0xff] }
  0x38   : > { %587 = vmatpush.bf16.msra.mxu1 %v1008_v15  ;;  %v1014_v24 = vld [vmem:[%s1181_s7 + $0xa0] sm:$0xff]  ;;  %v1013_v28 = vld [vmem:[%s1181_s7 + $0x98] sm:$0xff]  ;;  %v1012_v32 = vld [vmem:[%s1181_s7 + $0x90] sm:$0xff] }
  0x39   : > { %606 = vmatpush.bf16.msra.mxu2 %v1016_v16  ;;  %v1022_v25 = vld [vmem:[%s1181_s7 + $0xe0] sm:$0xff]  ;;  %v1021_v29 = vld [vmem:[%s1181_s7 + $0xd8] sm:$0xff]  ;;  %v1020_v33 = vld [vmem:[%s1181_s7 + $0xd0] sm:$0xff] }
  0x3a   : > { %625 = vmatpush.bf16.msra.mxu3 %v1024_v17  ;;  %v995_v34 = vld [vmem:[%s1181_s7 + $0x8] sm:$0xff]  ;;  %v994_v38 = vld [vmem:[%s1181_s7] sm:$0xff]  ;;  %v988_v43 = vld [vmem:[%s1183_s8 + $0xc] sm:$0xf0] }
  0x3b   : > { %569 = vmatpush.bf16.msra.mxu0 %v999_v18  ;;  %v1003_v35 = vld [vmem:[%s1181_s7 + $0x48] sm:$0xff]  ;;  %v1002_v39 = vld [vmem:[%s1181_s7 + $0x40] sm:$0xff]  ;;  %v823_v45 = vld [vmem:[%s1183_s8 + $0x10] sm:$0xf0] }
  0x3c   : > { %588 = vmatpush.bf16.msra.mxu1 %v1007_v19  ;;  %v1011_v36 = vld [vmem:[%s1181_s7 + $0x88] sm:$0xff]  ;;  %v1010_v40 = vld [vmem:[%s1181_s7 + $0x80] sm:$0xff]  ;;  %v989_v47 = vld [vmem:[%s1183_s8 + $0x14] sm:$0xf0] }
  0x3d   : > { %607 = vmatpush.bf16.msra.mxu2 %v1015_v20  ;;  %v1019_v37 = vld [vmem:[%s1181_s7 + $0xc8] sm:$0xff]  ;;  %v1018_v41 = vld [vmem:[%s1181_s7 + $0xc0] sm:$0xff]  ;;  %v831_v49 = vld [vmem:[%s1183_s8 + $0x18] sm:$0xf0] }
  0x3e   : > { %626 = vmatpush.bf16.msra.mxu3 %v1023_v21  ;;  %v821_v42 = vld [vmem:[%s1183_s8] sm:$0xf]  ;;  %v986_v44 = vld [vmem:[%s1183_s8 + $0x4] sm:$0xf]  ;;  %v829_v46 = vld [vmem:[%s1183_s8 + $0x8] sm:$0xf] }
  0x3f   : > { %570 = vmatpush.bf16.msra.mxu0 %v998_v22  ;;  %v987_v48 = vld [vmem:[%s1183_s8 + $0xc] sm:$0xf]  ;;  %v822_v50 = vor.u32 %v988_v43, %v821_v42  ;;  %v826_v51 = vor.u32 %v986_v44, %v823_v45  ;;  %v830_v52 = vor.u32 %v989_v47, %v829_v46  ;;  %v837_v54 = vld [vmem:[%s1183_s8 + $0x20] sm:$0xf]  ;;  %v992_v55 = vld [vmem:[%s1183_s8 + $0x2c] sm:$0xf0] }
  0x40   : > { %589 = vmatpush.bf16.msra.mxu1 %v1006_v23  ;;  %v834_v53 = vor.u32 %v987_v48, %v831_v49  ;;  %v990_v56 = vld [vmem:[%s1183_s8 + $0x24] sm:$0xf]  ;;  %v839_v57 = vld [vmem:[%s1183_s8 + $0x30] sm:$0xf0]  ;;  %v845_v58 = vld [vmem:[%s1183_s8 + $0x28] sm:$0xf]  ;;  %v838_v62 = vor.u32 %v992_v55, %v837_v54 }
  0x41   : > { %608 = vmatpush.bf16.msra.mxu2 %v1014_v24  ;;  %v993_v59 = vld [vmem:[%s1183_s8 + $0x34] sm:$0xf0]  ;;  %v991_v60 = vld [vmem:[%s1183_s8 + $0x2c] sm:$0xf]  ;;  %v847_v61 = vld [vmem:[%s1183_s8 + $0x38] sm:$0xf0]  ;;  %v842_v63 = vor.u32 %v990_v56, %v839_v57 }
  0x42   : > { %627 = vmatpush.bf16.msra.mxu3 %v1022_v25  ;;  %v846_v0 = vor.u32 %v993_v59, %v845_v58  ;;  %v850_v1 = vor.u32 %v991_v60, %v847_v61  ;;  %v259_v10 = vld [vmem:[#allocation2 + $0x10] sm:$0xff]  ;;  %v260_v17 = vld [vmem:[#allocation2] sm:$0xff] }
  0x43   : > { %571 = vmatpush.bf16.msra.mxu0 %v997_v26  ;;  %v261_v26 = vld [vmem:[#allocation2 + $0x18] sm:$0xff] }
  0x44   : > { %590 = vmatpush.bf16.msra.mxu1 %v1005_v27 }
  0x45   : > { %609 = vmatpush.bf16.msra.mxu2 %v1013_v28 }
  0x46   : > { %628 = vmatpush.bf16.msra.mxu3 %v1021_v29 }
  0x47   : > { %572 = vmatpush.bf16.msra.mxu0 %v996_v30 }
  0x48   : > { %591 = vmatpush.bf16.msra.mxu1 %v1004_v31 }
  0x49   : > { %610 = vmatpush.bf16.msra.mxu2 %v1012_v32 }
  0x4a   : > { %629 = vmatpush.bf16.msra.mxu3 %v1020_v33 }
  0x4b   : > { %573 = vmatpush.bf16.msra.mxu0 %v995_v34  ;;  %v262_v34 = vld [vmem:[#allocation2 + $0x8] sm:$0xff] }
  0x4c   : > { %592 = vmatpush.bf16.msra.mxu1 %v1003_v35 }
  0x4d   : > { %611 = vmatpush.bf16.msra.mxu2 %v1011_v36 }
  0x4e   : > { %630 = vmatpush.bf16.msra.mxu3 %v1019_v37 }
  0x4f   : > { %574 = vmatpush.bf16.msra.mxu0 %v994_v38 }
  0x50   : > { %593 = vmatpush.bf16.msra.mxu1 %v1002_v39 }
  0x51   : > { %612 = vmatpush.bf16.msra.mxu2 %v1010_v40 }
  0x52   : > { %631 = vmatpush.bf16.msra.mxu3 %v1018_v41  ;;  %575 = vmatmul.bf16.vlgmr.msra.gmra.mxu0 %v822_v50 }
  0x53   : > { %594 = vmatmul.bf16.vlgmr.msra.gmra.mxu1 %v826_v51 }
  0x54   : > { %613 = vmatmul.bf16.vlgmr.msra.gmra.mxu2 %v830_v52 }
  0x55   : > { %632 = vmatmul.bf16.vlgmr.msra.gmra.mxu3 %v834_v53 }
  0x62   : > { %580 = vmatmul.bf16.gmra.mxu0 %v838_v62 }
  0x63   : > { %599 = vmatmul.bf16.gmra.mxu1 %v842_v63 }
  0x64   : > { %618 = vmatmul.bf16.gmra.mxu2 %v846_v0 }
  0x65   : > { %637 = vmatmul.bf16.gmra.mxu3 %v850_v1 }
  0xcf   : > { %v576_v2 = vpop.f32.mrf.mxu0 }
  0xd0   : > { %v595_v3 = vpop.f32.mrf.mxu1 }
  0xd1   : > { %v596_v4 = vadd.f32 %v595_v3, %v576_v2 }
  0xd7   : > { %v614_v5 = vpop.f32.mrf.mxu2  ;;  %v578_v8 = vpop.f32.mrf.mxu0 }
  0xd8   : > { %v633_v6 = vpop.f32.mrf.mxu3  ;;  %v615_v7 = vadd.f32 %v614_v5, %v596_v4  ;;  %v597_v9 = vpop.f32.mrf.mxu1 }
  0xd9   : > { %v598_v13 = vadd.f32 %v597_v9, %v578_v8 }
  0xda   : > { %v634_v11 = vadd.f32 %v633_v6, %v615_v7 }
  0xdc   : > { %v643_v12 = vadd.f32 %v634_v11, %v259_v10 }
  0xde   : > { %647 = vst [vmem:[#allocation2 + $0x10] sm:$0xff] %v643_v12 }
  0xdf   : > { %v616_v14 = vpop.f32.mrf.mxu2  ;;  %v581_v18 = vpop.f32.mrf.mxu0 }
  0xe0   : > { %v635_v15 = vpop.f32.mrf.mxu3  ;;  %v617_v16 = vadd.f32 %v616_v14, %v598_v13  ;;  %v600_v19 = vpop.f32.mrf.mxu1 }
  0xe1   : > { %v601_v22 = vadd.f32 %v600_v19, %v581_v18 }
  0xe2   : > { %v636_v20 = vadd.f32 %v635_v15, %v617_v16 }
  0xe4   : > { %v644_v21 = vadd.f32 %v636_v20, %v260_v17 }
  0xe6   : > { %648 = vst [vmem:[#allocation2] sm:$0xff] %v644_v21 }
  0xe7   : > { %v619_v23 = vpop.f32.mrf.mxu2  ;;  %v583_v28 = vpop.f32.mrf.mxu0 }
  0xe8   : > { %v638_v24 = vpop.f32.mrf.mxu3  ;;  %v620_v25 = vadd.f32 %v619_v23, %v601_v22  ;;  %v602_v29 = vpop.f32.mrf.mxu1 }
  0xe9   : > { %v603_v31 = vadd.f32 %v602_v29, %v583_v28 }
  0xea   : > { %v639_v27 = vadd.f32 %v638_v24, %v620_v25 }
  0xec   : > { %v645_v30 = vadd.f32 %v639_v27, %v261_v26 }
  0xee   : > { %649 = vst [vmem:[#allocation2 + $0x18] sm:$0xff] %v645_v30 }
  0xef   : > { %v621_v32 = vpop.f32.mrf.mxu2 }
  0xf0   : > { %v622_v33 = vadd.f32 %v621_v32, %v603_v31  ;;  %v640_v35 = vpop.f32.mrf.mxu3 }
  0xf2   : > { %v641_v36 = vadd.f32 %v640_v35, %v622_v33  ;;  %654 = sbr.rel (%p979_p12) target bundleno = 273 (0x111), region = 63 }
  0xf4   : > { %v646_v37 = vadd.f32 %v641_v36, %v262_v34 }
  0xf6   : > { %650 = vst [vmem:[#allocation2 + $0x8] sm:$0xff] %v646_v37 }
  0xf7   : > { %v655_v38 = vld [vmem:[#allocation2 + $0x10] sm:$0xff]  ;;  %v656_v39 = vld [vmem:[#allocation2] sm:$0xff]  ;;  %v657_v40 = vld [vmem:[#allocation2 + $0x18] sm:$0xff] }
  0xf8   : > { %659 = vst [vmem:[%s1279_s2] sm:$0xff] %v655_v38  ;;  %v703_v41 = vmul.f32 %v655_v38, %v655_v38  ;;  %v691_v42 = vadd.f32 %v656_v39, %v655_v38  ;;  %v704_v43 = vmul.f32 %v656_v39, %v656_v39  ;;  %v705_v44 = vmul.f32 %v657_v40, %v657_v40  ;;  %v690_v61 = vld [vmem:[%s1280_s3] sm:$0x1]  ;;  %v702_v0 = vld [vmem:[%s1280_s3 + $0x1] sm:$0x1] }
  0xf9   : > { %660 = vst [vmem:[%s1279_s2 + $0x8] sm:$0xff] %v656_v39 }
  0xfa   : > { %v707_v46 = vadd.f32 %v704_v43, %v703_v41  ;;  %661 = vst [vmem:[%s1279_s2 + $0x10] sm:$0xff] %v657_v40  ;;  %v692_v47 = vadd.f32 %v691_v42, %v657_v40 }
  0xfc   : > { %v708_v49 = vadd.f32 %v707_v46, %v705_v44 }
  0xfd   : > { %v658_v45 = vld [vmem:[#allocation2 + $0x8] sm:$0xff] }
  0xfe   : > { %v706_v48 = vmul.f32 %v658_v45, %v658_v45  ;;  %662 = vst [vmem:[%s1279_s2 + $0x18] sm:$0xff] %v658_v45  ;;  %v693_v50 = vadd.f32 %v692_v47, %v658_v45 }
 0x100   : > { %v694_v51 = vrot.slane %v693_v50, 4  ;;  %v709_v52 = vadd.f32 %v708_v49, %v706_v48 }
 0x102   : > { %v695_v53 = vadd.f32 %v694_v51, %v693_v50  ;;  %v710_v54 = vrot.slane %v709_v52, 4 }
 0x104   : > { %v696_v55 = vrot.slane %v695_v53, 2  ;;  %v711_v56 = vadd.f32 %v710_v54, %v709_v52 }
 0x106   : > { %v697_v57 = vadd.f32 %v696_v55, %v695_v53  ;;  %v712_v58 = vrot.slane %v711_v56, 2 }
 0x108   : > { %v698_v59 = vrot.slane %v697_v57, 1  ;;  %v713_v60 = vadd.f32 %v712_v58, %v711_v56 }
 0x10a   : > { %v699_v62 = vadd.f32 %v698_v59, %v697_v57  ;;  %v714_v63 = vrot.slane %v713_v60, 1 }
 0x10c   : > { %v700_v1 = vadd.f32 %v699_v62, %v690_v61  ;;  %v715_v2 = vadd.f32 %v714_v63, %v713_v60 }
 0x10e   : > { %701 = vst [vmem:[%s1280_s3] sm:$0x1] %v700_v1  ;;  %v716_v3 = vadd.f32 %v715_v2, %v702_v0 }
 0x110   : > { %717 = vst [vmem:[%s1280_s3 + $0x1] sm:$0x1] %v716_v3 }
 0x111 PF: > { %s14_s16 = sadd.s32 1, %s1106_s16   ;;  %s1281_s12 = smov %s1094_s13 }
 0x112   : > { %p11_p13 = scmp.ge.s32.totalorder %s14_s16, 4   ;;  %s1282_s13 = smov %s1165_s20 }
 0x113   : > { %s1283_s14 = smov %s1102_s15  ;;  %s1284_s15 = smov %s1286_s17 }
 0x114   :  { %13 = sbr.rel (!%p11_p13) target bundleno = 3 (0x3), region = 109 }

// kernel: discriminator_forward.10
= control target key start
LH: loop header
LB: loop body
LE: loop exit
PB: predicated region body
PF: predicated region fallthrough
CT: control target
= control target key end

     0   :  { %s162_s1 = inlined_call_operand.vmem [shape: f32[2,256], index: 1, kind: input, shape index: {}]   ;;  %s163_s0 = inlined_call_operand.vmem [shape: f32[16,256], index: 0, kind: input, shape index: {}]   ;;  %s164_s2 = inlined_call_operand.vmem [shape: f32[1,256], index: 2, kind: input, shape index: {}]   ;;  %s165_s3 = inlined_call_operand.vmem [shape: f32[1,256], index: 3, kind: input, shape index: {}]   ;;  %s166_s4 = inlined_call_operand.vmem [shape: f32[16,256], index: 4, kind: output, shape index: {}]  }
   0x1   :  { %v17_v0 = vld [vmem:[%s162_s1] ss:$2 sm:$0x3]  ;;  %v98_v1 = vld [vmem:[%s162_s1 + $0x1] ss:$2 sm:$0x3] }
   0x2   :  { %v18_v2 = vmul.f32 0.125, %v17_v0  ;;  %v21_v3 = vmul.f32 0.125, %v98_v1  ;;  %v36_v12 = vld [vmem:[%s163_s0] sm:$0xff]  ;;  %v37_v16 = vld [vmem:[%s163_s0 + $0x8] sm:$0xff]  ;;  %v38_v17 = vld [vmem:[%s163_s0 + $0x10] sm:$0xff] }
   0x3   :  { %v39_v18 = vld [vmem:[%s163_s0 + $0x18] sm:$0xff]  ;;  %v58_v20 = vld [vmem:[%s164_s2] sm:$0x3] }
   0x4   :  { %v22_v4 = vmul.f32 %v18_v2, %v18_v2  ;;  %v41_v13 = vperm.slane %v18_v2, 0  ;;  %v42_v14 = vperm.slane %v18_v2, 1  ;;  %v68_v22 = vld [vmem:[%s165_s3] sm:$0x3]  ;;  %v60_v28 = vperm.slane %v58_v20, 0 }
   0x5   :  { %v61_v30 = vperm.slane %v58_v20, 1  ;;  %v70_v31 = vperm.slane %v68_v22, 0  ;;  %v71_v32 = vperm.slane %v68_v22, 1 }
   0x6   :  { %v23_v5 = vsub.f32 %v21_v3, %v22_v4  ;;  %v45_v21 = vsub.f32 %v36_v12, %v41_v13  ;;  %v46_v23 = vsub.f32 %v37_v16, %v42_v14  ;;  %v47_v24 = vsub.f32 %v38_v17, %v41_v13 }
   0x7   :  { %v48_v25 = vsub.f32 %v39_v18, %v42_v14 }
   0x8   :  { %v24_v6 = vmax.f32 %v23_v5, 0.0 }
   0xa   :  { %v25_v7 = vadd.f32 1e-05, %v24_v6 }
   0xc   :  { %99 = vrsqrt.f32 %v25_v7  ;;  %vm32_vm0 = vweird.f32 %v25_v7 }
  0x12   :  { %v100_v8 = vpop.eup %99 }
  0x13   :  { %v27_v9 = vmul.f32 %v100_v8, %v25_v7  ;;  %vm33_vm1 = vweird.f32 %v100_v8 }
  0x14   :  { %vm34_vm2 = vmor %vm32_vm0, %vm33_vm1 }
  0x15   :  { %v28_v10 = vmul.f32 %v100_v8, %v27_v9 }
  0x17   :  { %v29_v11 = vmul.f32 0.5, %v28_v10 }
  0x19   :  { %v30_v15 = vsub.f32 1.5, %v29_v11 }
  0x1b   :  { %v31_v19 = vmul.f32 %v100_v8, %v30_v15 }
  0x1d   :  { %v35_v26 = vsel %vm34_vm2, %v100_v8, %v31_v19 }
  0x1e   :  { %v50_v27 = vperm.slane %v35_v26, 0  ;;  %v51_v29 = vperm.slane %v35_v26, 1 }
  0x20   :  { %v54_v33 = vmul.f32 %v50_v27, %v45_v21  ;;  %v55_v34 = vmul.f32 %v51_v29, %v46_v23  ;;  %v56_v35 = vmul.f32 %v50_v27, %v47_v24  ;;  %v57_v36 = vmul.f32 %v51_v29, %v48_v25 }
  0x22   :  { %v64_v37 = vmul.f32 %v60_v28, %v54_v33  ;;  %v65_v38 = vmul.f32 %v61_v30, %v55_v34  ;;  %v66_v39 = vmul.f32 %v60_v28, %v56_v35  ;;  %v67_v40 = vmul.f32 %v61_v30, %v57_v36 }
  0x24   :  { %v74_v41 = vadd.f32 %v70_v31, %v64_v37  ;;  %v75_v42 = vadd.f32 %v71_v32, %v65_v38  ;;  %v76_v43 = vadd.f32 %v70_v31, %v66_v39  ;;  %v77_v44 = vadd.f32 %v71_v32, %v67_v40 }
  0x26   :  { %vm78_vm3 = vcmp.ge.f32.partialorder %v74_v41, 0.0  ;;  %v82_v45 = vmul.f32 0.2, %v74_v41  ;;  %vm79_vm4 = vcmp.ge.f32.partialorder %v75_v42, 0.0  ;;  %v83_v46 = vmul.f32 0.2, %v75_v42 }
  0x27   :  { %vm80_vm5 = vcmp.ge.f32.partialorder %v76_v43, 0.0  ;;  %v84_v47 = vmul.f32 0.2, %v76_v43  ;;  %vm81_vm6 = vcmp.ge.f32.partialorder %v77_v44, 0.0  ;;  %v85_v48 = vmul.f32 0.2, %v77_v44 }
  0x28   :  { %v86_v49 = vsel %vm78_vm3, %v74_v41, %v82_v45  ;;  %v87_v50 = vsel %vm79_vm4, %v75_v42, %v83_v46 }
  0x29   :  { %90 = vst [vmem:[%s166_s4] sm:$0xff] %v86_v49  ;;  %v88_v51 = vsel %vm80_vm5, %v76_v43, %v84_v47  ;;  %v89_v52 = vsel %vm81_vm6, %v77_v44, %v85_v48 }
  0x2a   :  { %91 = vst [vmem:[%s166_s4 + $0x8] sm:$0xff] %v87_v50 }
  0x2b   :  { %92 = vst [vmem:[%s166_s4 + $0x10] sm:$0xff] %v88_v51 }
  0x2c   :  { %93 = vst [vmem:[%s166_s4 + $0x18] sm:$0xff] %v89_v52 }

// kernel: discriminator_forward.9
= control target key start
LH: loop header
LB: loop body
LE: loop exit
PB: predicated region body
PF: predicated region fallthrough
CT: control target
= control target key end

     0   :  { %s1429_s12 = smov 0   ;;  %s1431_s13 = smov 0   ;;  %s1680_s0 = inlined_call_operand.vmem [shape: bf16[16,2048], index: 0, kind: input, shape index: {}]   ;;  %s1681_s1 = inlined_call_operand.vmem [shape: bf16[2048,256], index: 1, kind: input, shape index: {}]   ;;  %s1682_s2 = inlined_call_operand.vmem [shape: f32[16,256], index: 2, kind: output, shape index: {0}]   ;;  %s1683_s3 = inlined_call_operand.vmem [shape: f32[2,256], index: 3, kind: output, shape index: {1}]  }
   0x1   :  { %s1433_s14 = smov 0   ;;  %s1435_s15 = smov 0  }
   0x2   :  { %s1437_s16 = smov 0  }
   0x3 LB: > { %s23_s17 = sadd.s32 1, %s1401_s15  ;;  %p42_p1 = scmp.ne.s32.totalorder %s1393_s13, %s1389_s12  ;;  %s1405_s16 = sphi %s1437_s16, %s14_s16   ;;  %s1401_s15 = sphi %s1435_s15, %s1687_s15   ;;  %s1397_s14 = sphi %s1433_s14, %s1686_s14   ;;  %s1393_s13 = sphi %s1431_s13, %s1685_s13   ;;  %s1389_s12 = sphi %s1429_s12, %s1684_s12  }
   0x4   : > { %p24_p0 = scmp.ge.s32.totalorder %s23_s17, 4  ;;  %p43_p2 = scmp.eq.s32.totalorder %s1405_s16, 0 }
   0x5   : > { %s35_s19 = sadd.s32 1, %s1393_s13  ;;  %p964_p5 = scmp.ge.s32.totalorder %s1405_s16, 4 }
   0x6   : > { %s1689_s17 = smov (%p24_p0, %s23_s17), 0  ;;  %p44_p3 = por %p43_p2, %p42_p1 }
   0x7   : > { %s31_s18 = ssub.s32 %s1401_s15, %s1689_s17  ;;  %141 = sbr.rel (%p964_p5) target bundleno = 20 (0x14), region = 16 }
   0x8   : > { %p33_p4 = scmp.eq.s32.totalorder %s31_s18, 0 }
   0xa   : > { %s1464_s20 = scalar_select %p33_p4, %s1393_s13, %s35_s19  }
   0xc   : > { %144 = sbr.rel (!%p44_p3) target bundleno = 20 (0x14), region = 20  ;;  %s146_s21 = sand.u32 (%p44_p3), 1, %s1393_s13  }
   0xd   : > { %s1254_s22 = sshll.u32 (%p44_p3), %s1401_s15, 4  ;;  %s965_s23 = sshll.u32 (%p44_p3), %s146_s21, 5 }
   0xe   : > { %s154_s26 = scalar_lea.vmem (%p44_p3), %s1680_s0, %s1254_s22  ;;  %s148_s27 = scalar_lea.vmem (%p44_p3), [#allocation3], %s965_s23 }
   0xf   : > { %v167_v0 = vld [vmem:[%s154_s26] sm:$0xff] (%p44_p3)  ;;  %v169_v1 = vld [vmem:[%s154_s26 + $0x8] sm:$0xff] (%p44_p3) }
  0x10   : > { %v171_v2 = vld [vmem:[%s154_s26 + $0x40] sm:$0xff] (%p44_p3)  ;;  %168 = vst [vmem:[%s148_s27] sm:$0xff] (%p44_p3), %v167_v0  ;;  %v173_v3 = vld [vmem:[%s154_s26 + $0x48] sm:$0xff] (%p44_p3) }
  0x11   : > { %170 = vst [vmem:[%s148_s27 + $0x8] sm:$0xff] %v169_v1 }
  0x12   : > { %172 = vst [vmem:[%s148_s27 + $0x10] sm:$0xff] %v171_v2 }
  0x13   : > { %174 = vst [vmem:[%s148_s27 + $0x18] sm:$0xff] %v173_v3 }
  0x14 PF: > { %p968_p6 = scmp.ge.s32.totalorder %s1405_s16, 1  ;;  %p189_p7 = scmp.lt.s32.totalorder %s1405_s16, 5 }
  0x16   : > { %p190_p8 = pnand %p968_p6, %p189_p7 }
  0x17   : > { %s196_s28 = sand.u32 (!%p190_p8), 1, %s1389_s12   ;;  %s970_s29 = sshll.u32 (!%p190_p8), %s1397_s14, 6 }
  0x18   : > { %193 = sbr.rel (%p190_p8) target bundleno = 282 (0x11a), region = 47  ;;  %s969_s30 = sshll.u32 (!%p190_p8), %s196_s28, 5 }
  0x19   : > { %p229_p9 = scmp.lt.s32.totalorder (!%p190_p8), %s970_s29, 255  ;;  %p243_p10 = scmp.eq.s32.totalorder (!%p190_p8), %s1397_s14, 0 }
  0x1a   : > { %s1482_s8 = scalar_lea.vmem (!%p190_p8), [#allocation3], %s969_s30 }
  0x1d   : > { %s1691_s29 = smov (!%p229_p9, %s970_s29), 255  ;;  %247 = sbr.rel (!%p243_p10) target bundleno = 34 (0x22), region = 55  ;;  %v1407_v4 = vmov (%p243_p10), 0.0  }
  0x1e   : > { %s1255_s4 = sshll.u32 %s1691_s29, 3  ;;  %248 = vst [vmem:[%s1683_s3] sm:$0xf] (%p243_p10), %v1407_v4 }
  0x1f   : > { %s1480_s7 = scalar_lea.vmem %s1681_s1, %s1255_s4 }
  0x22 PF: > { %p974_p11 = scmp.ne.s32.totalorder %s1397_s14, 0 }
  0x24   : > { %251 = sbr.rel (%p974_p11) target bundleno = 46 (0x2e), region = 59 }
  0x29   : > { %v1408_v5 = vmov 0.0  }
  0x2a   : > { %252 = vst [vmem:[#allocation2 + $0x10] sm:$0xff] %v1408_v5 }
  0x2b   : > { %253 = vst [vmem:[#allocation2] sm:$0xff] %v1408_v5 }
  0x2c   : > { %254 = vst [vmem:[#allocation2 + $0x18] sm:$0xff] %v1408_v5 }
  0x2d   : > { %255 = vst [vmem:[#allocation2 + $0x8] sm:$0xff] %v1408_v5 }
  0x2e PF: > { %v1049_v6 = vld [vmem:[%s1480_s7 + $0x70] sm:$0xf]  ;;  %v1276_v7 = vld [vmem:[%s1480_s7 + $0x74] sm:$0xf0]  ;;  %v1041_v17 = vld [vmem:[%s1480_s7 + $0x60] sm:$0xf] }
  0x2f   : > { %v1113_v8 = vld [vmem:[%s1480_s7 + $0xf0] sm:$0xf]  ;;  %v1050_v9 = vor.u32 %v1276_v7, %v1049_v6  ;;  %v1292_v10 = vld [vmem:[%s1480_s7 + $0xf4] sm:$0xf0]  ;;  %v1274_v19 = vld [vmem:[%s1480_s7 + $0x64] sm:$0xf0] }
  0x30   : > { %v1177_v11 = vld [vmem:[%s1480_s7 + $0x170] sm:$0xf]  ;;  %v1308_v12 = vld [vmem:[%s1480_s7 + $0x174] sm:$0xf0]  ;;  %v1114_v13 = vor.u32 %v1292_v10, %v1113_v8  ;;  %v1105_v20 = vld [vmem:[%s1480_s7 + $0xe0] sm:$0xf]  ;;  %v1042_v22 = vor.u32 %v1274_v19, %v1041_v17 }
  0x31   : > { %v1178_v14 = vor.u32 %v1308_v12, %v1177_v11  ;;  %v1241_v15 = vld [vmem:[%s1480_s7 + $0x1f0] sm:$0xf]  ;;  %v1324_v16 = vld [vmem:[%s1480_s7 + $0x1f4] sm:$0xf0]  ;;  %668 = vmatpush.bf16.msra.mxu0 %v1050_v9  ;;  %v1290_v21 = vld [vmem:[%s1480_s7 + $0xe4] sm:$0xf0] }
  0x32   : > { %v1242_v18 = vor.u32 %v1324_v16, %v1241_v15  ;;  %682 = vmatpush.bf16.msra.mxu1 %v1114_v13  ;;  %v1106_v23 = vor.u32 %v1290_v21, %v1105_v20  ;;  %v1169_v24 = vld [vmem:[%s1480_s7 + $0x160] sm:$0xf]  ;;  %v1306_v25 = vld [vmem:[%s1480_s7 + $0x164] sm:$0xf0]  ;;  %v1033_v29 = vld [vmem:[%s1480_s7 + $0x50] sm:$0xf] }
  0x33   : > { %696 = vmatpush.bf16.msra.mxu2 %v1178_v14  ;;  %v1233_v26 = vld [vmem:[%s1480_s7 + $0x1e0] sm:$0xf]  ;;  %v1170_v27 = vor.u32 %v1306_v25, %v1169_v24  ;;  %v1322_v28 = vld [vmem:[%s1480_s7 + $0x1e4] sm:$0xf0]  ;;  %v1272_v30 = vld [vmem:[%s1480_s7 + $0x54] sm:$0xf0] }
  0x34   : > { %710 = vmatpush.bf16.msra.mxu3 %v1242_v18  ;;  %v1234_v31 = vor.u32 %v1322_v28, %v1233_v26  ;;  %v1097_v32 = vld [vmem:[%s1480_s7 + $0xd0] sm:$0xf]  ;;  %v1288_v33 = vld [vmem:[%s1480_s7 + $0xd4] sm:$0xf0]  ;;  %v1034_v35 = vor.u32 %v1272_v30, %v1033_v29  ;;  %v1025_v41 = vld [vmem:[%s1480_s7 + $0x40] sm:$0xf] }
  0x35   : > { %v1161_v34 = vld [vmem:[%s1480_s7 + $0x150] sm:$0xf]  ;;  %669 = vmatpush.bf16.msra.mxu0 %v1042_v22  ;;  %v1304_v36 = vld [vmem:[%s1480_s7 + $0x154] sm:$0xf0]  ;;  %v1098_v39 = vor.u32 %v1288_v33, %v1097_v32  ;;  %v1270_v42 = vld [vmem:[%s1480_s7 + $0x44] sm:$0xf0] }
  0x36   : > { %v1225_v37 = vld [vmem:[%s1480_s7 + $0x1d0] sm:$0xf]  ;;  %v1320_v38 = vld [vmem:[%s1480_s7 + $0x1d4] sm:$0xf0]  ;;  %683 = vmatpush.bf16.msra.mxu1 %v1106_v23  ;;  %v1162_v40 = vor.u32 %v1304_v36, %v1161_v34  ;;  %v1089_v43 = vld [vmem:[%s1480_s7 + $0xc0] sm:$0xf]  ;;  %v1026_v50 = vor.u32 %v1270_v42, %v1025_v41 }
  0x37   : > { %697 = vmatpush.bf16.msra.mxu2 %v1170_v27  ;;  %v1226_v44 = vor.u32 %v1320_v38, %v1225_v37  ;;  %v1286_v45 = vld [vmem:[%s1480_s7 + $0xc4] sm:$0xf0]  ;;  %v1153_v46 = vld [vmem:[%s1480_s7 + $0x140] sm:$0xf]  ;;  %v1017_v53 = vld [vmem:[%s1480_s7 + $0x30] sm:$0xf] }
  0x38   : > { %711 = vmatpush.bf16.msra.mxu3 %v1234_v31  ;;  %v1302_v47 = vld [vmem:[%s1480_s7 + $0x144] sm:$0xf0]  ;;  %v1217_v48 = vld [vmem:[%s1480_s7 + $0x1c0] sm:$0xf]  ;;  %v1090_v51 = vor.u32 %v1286_v45, %v1089_v43  ;;  %v1268_v54 = vld [vmem:[%s1480_s7 + $0x34] sm:$0xf0] }
  0x39   : > { %v1318_v49 = vld [vmem:[%s1480_s7 + $0x1c4] sm:$0xf0]  ;;  %670 = vmatpush.bf16.msra.mxu0 %v1034_v35  ;;  %v1154_v52 = vor.u32 %v1302_v47, %v1153_v46  ;;  %v1081_v55 = vld [vmem:[%s1480_s7 + $0xb0] sm:$0xf]  ;;  %v1284_v57 = vld [vmem:[%s1480_s7 + $0xb4] sm:$0xf0]  ;;  %v1018_v62 = vor.u32 %v1268_v54, %v1017_v53 }
  0x3a   : > { %684 = vmatpush.bf16.msra.mxu1 %v1098_v39  ;;  %v1218_v56 = vor.u32 %v1318_v49, %v1217_v48  ;;  %v1145_v58 = vld [vmem:[%s1480_s7 + $0x130] sm:$0xf]  ;;  %v1300_v59 = vld [vmem:[%s1480_s7 + $0x134] sm:$0xf0]  ;;  %v1082_v63 = vor.u32 %v1284_v57, %v1081_v55  ;;  %v1009_v1 = vld [vmem:[%s1480_s7 + $0x20] sm:$0xf] }
  0x3b   : > { %698 = vmatpush.bf16.msra.mxu2 %v1162_v40  ;;  %v1209_v60 = vld [vmem:[%s1480_s7 + $0x1b0] sm:$0xf]  ;;  %v1316_v61 = vld [vmem:[%s1480_s7 + $0x1b4] sm:$0xf0]  ;;  %v1146_v0 = vor.u32 %v1300_v59, %v1145_v58  ;;  %v1266_v2 = vld [vmem:[%s1480_s7 + $0x24] sm:$0xf0] }
  0x3c   : > { %712 = vmatpush.bf16.msra.mxu3 %v1226_v44  ;;  %v1073_v3 = vld [vmem:[%s1480_s7 + $0xa0] sm:$0xf]  ;;  %v1210_v4 = vor.u32 %v1316_v61, %v1209_v60  ;;  %v1282_v5 = vld [vmem:[%s1480_s7 + $0xa4] sm:$0xf0]  ;;  %v1010_v10 = vor.u32 %v1266_v2, %v1009_v1  ;;  %v1001_v13 = vld [vmem:[%s1480_s7 + $0x10] sm:$0xf] }
  0x3d   : > { %671 = vmatpush.bf16.msra.mxu0 %v1026_v50  ;;  %v1137_v6 = vld [vmem:[%s1480_s7 + $0x120] sm:$0xf]  ;;  %v1298_v7 = vld [vmem:[%s1480_s7 + $0x124] sm:$0xf0]  ;;  %v1074_v11 = vor.u32 %v1282_v5, %v1073_v3  ;;  %v1264_v14 = vld [vmem:[%s1480_s7 + $0x14] sm:$0xf0] }
  0x3e   : > { %685 = vmatpush.bf16.msra.mxu1 %v1090_v51  ;;  %v1201_v8 = vld [vmem:[%s1480_s7 + $0x1a0] sm:$0xf]  ;;  %v1314_v9 = vld [vmem:[%s1480_s7 + $0x1a4] sm:$0xf0]  ;;  %v1138_v12 = vor.u32 %v1298_v7, %v1137_v6  ;;  %v1065_v15 = vld [vmem:[%s1480_s7 + $0x90] sm:$0xf]  ;;  %v1002_v23 = vor.u32 %v1264_v14, %v1001_v13 }
  0x3f   : > { %699 = vmatpush.bf16.msra.mxu2 %v1154_v52  ;;  %v1202_v16 = vor.u32 %v1314_v9, %v1201_v8  ;;  %v1280_v17 = vld [vmem:[%s1480_s7 + $0x94] sm:$0xf0]  ;;  %v1129_v18 = vld [vmem:[%s1480_s7 + $0x110] sm:$0xf]  ;;  %v993_v22 = vld [vmem:[%s1480_s7] sm:$0xf] }
  0x40   : > { %713 = vmatpush.bf16.msra.mxu3 %v1218_v56  ;;  %v1296_v19 = vld [vmem:[%s1480_s7 + $0x114] sm:$0xf0]  ;;  %v1193_v20 = vld [vmem:[%s1480_s7 + $0x190] sm:$0xf]  ;;  %v1262_v24 = vld [vmem:[%s1480_s7 + $0x4] sm:$0xf0]  ;;  %v1066_v27 = vor.u32 %v1280_v17, %v1065_v15 }
  0x41   : > { %672 = vmatpush.bf16.msra.mxu0 %v1018_v62  ;;  %v1312_v21 = vld [vmem:[%s1480_s7 + $0x194] sm:$0xf0]  ;;  %v1057_v25 = vld [vmem:[%s1480_s7 + $0x80] sm:$0xf]  ;;  %v1278_v26 = vld [vmem:[%s1480_s7 + $0x84] sm:$0xf0]  ;;  %v1130_v28 = vor.u32 %v1296_v19, %v1129_v18  ;;  %v994_v39 = vor.u32 %v1262_v24, %v993_v22 }
  0x42   : > { %686 = vmatpush.bf16.msra.mxu1 %v1082_v63  ;;  %v1121_v29 = vld [vmem:[%s1480_s7 + $0x100] sm:$0xf]  ;;  %v1294_v30 = vld [vmem:[%s1480_s7 + $0x104] sm:$0xf0]  ;;  %v1194_v32 = vor.u32 %v1312_v21, %v1193_v20  ;;  %v1275_v34 = vld [vmem:[%s1480_s7 + $0x74] sm:$0xf]  ;;  %v1058_v43 = vor.u32 %v1278_v26, %v1057_v25 }
  0x43   : > { %700 = vmatpush.bf16.msra.mxu2 %v1146_v0  ;;  %v1185_v31 = vld [vmem:[%s1480_s7 + $0x180] sm:$0xf]  ;;  %v1310_v33 = vld [vmem:[%s1480_s7 + $0x184] sm:$0xf0]  ;;  %v1051_v35 = vld [vmem:[%s1480_s7 + $0x78] sm:$0xf0]  ;;  %v1122_v44 = vor.u32 %v1294_v30, %v1121_v29 }
  0x44   : > { %714 = vmatpush.bf16.msra.mxu3 %v1210_v4  ;;  %v1291_v36 = vld [vmem:[%s1480_s7 + $0xf4] sm:$0xf]  ;;  %v1115_v37 = vld [vmem:[%s1480_s7 + $0xf8] sm:$0xf0]  ;;  %v1273_v45 = vld [vmem:[%s1480_s7 + $0x64] sm:$0xf]  ;;  %v1186_v49 = vor.u32 %v1310_v33, %v1185_v31  ;;  %v1054_v50 = vor.u32 %v1275_v34, %v1051_v35 }
  0x45   : > { %673 = vmatpush.bf16.msra.mxu0 %v1010_v10  ;;  %v1307_v38 = vld [vmem:[%s1480_s7 + $0x174] sm:$0xf]  ;;  %v1179_v40 = vld [vmem:[%s1480_s7 + $0x178] sm:$0xf0]  ;;  %v1043_v46 = vld [vmem:[%s1480_s7 + $0x68] sm:$0xf0]  ;;  %v1118_v55 = vor.u32 %v1291_v36, %v1115_v37 }
  0x46   : > { %687 = vmatpush.bf16.msra.mxu1 %v1074_v11  ;;  %v1323_v41 = vld [vmem:[%s1480_s7 + $0x1f4] sm:$0xf]  ;;  %v1243_v42 = vld [vmem:[%s1480_s7 + $0x1f8] sm:$0xf0]  ;;  %v985_v47 = vld [vmem:[%s1482_s8 + $0x8] sm:$0xf]  ;;  %v1182_v56 = vor.u32 %v1307_v38, %v1179_v40  ;;  %v1046_v5 = vor.u32 %v1273_v45, %v1043_v46 }
  0x47   : > { %701 = vmatpush.bf16.msra.mxu2 %v1138_v12  ;;  %v1260_v48 = vld [vmem:[%s1482_s8 + $0x14] sm:$0xf0]  ;;  %v1289_v51 = vld [vmem:[%s1480_s7 + $0xe4] sm:$0xf]  ;;  %v1107_v52 = vld [vmem:[%s1480_s7 + $0xe8] sm:$0xf0]  ;;  %v1246_v60 = vor.u32 %v1323_v41, %v1243_v42 }
  0x48   : > { %715 = vmatpush.bf16.msra.mxu3 %v1202_v16  ;;  %v1305_v53 = vld [vmem:[%s1480_s7 + $0x164] sm:$0xf]  ;;  %v1171_v54 = vld [vmem:[%s1480_s7 + $0x168] sm:$0xf0]  ;;  %v987_v58 = vld [vmem:[%s1482_s8 + $0x18] sm:$0xf0]  ;;  %v1571_v61 = vor.u32 %v1260_v48, %v985_v47  ;;  %v1110_v7 = vor.u32 %v1289_v51, %v1107_v52 }
  0x49   : > { %674 = vmatpush.bf16.msra.mxu0 %v1002_v23  ;;  %v1258_v57 = vld [vmem:[%s1482_s8 + $0xc] sm:$0xf]  ;;  %v977_v59 = vld [vmem:[%s1482_s8] sm:$0xf]  ;;  %v1259_v62 = vld [vmem:[%s1482_s8 + $0xc] sm:$0xf0]  ;;  %v1174_v8 = vor.u32 %v1305_v53, %v1171_v54 }
  0x4a   : > { %688 = vmatpush.bf16.msra.mxu1 %v1066_v27  ;;  %v1257_v63 = vld [vmem:[%s1482_s8 + $0x4] sm:$0xf]  ;;  %v979_v0 = vld [vmem:[%s1482_s8 + $0x10] sm:$0xf0]  ;;  %v1235_v2 = vld [vmem:[%s1480_s7 + $0x1e8] sm:$0xf0]  ;;  %v1578_v3 = vor.u32 %v1258_v57, %v987_v58  ;;  %v1580_v4 = vor.u32 %v1259_v62, %v977_v59 }
  0x4b   : > { %702 = vmatpush.bf16.msra.mxu2 %v1130_v28  ;;  %v1321_v1 = vld [vmem:[%s1480_s7 + $0x1e4] sm:$0xf]  ;;  %v1582_v6 = vor.u32 %v1257_v63, %v979_v0  ;;  %v1271_v9 = vld [vmem:[%s1480_s7 + $0x54] sm:$0xf]  ;;  %v1035_v10 = vld [vmem:[%s1480_s7 + $0x58] sm:$0xf0] }
  0x4c   : > { %716 = vmatpush.bf16.msra.mxu3 %v1194_v32  ;;  %v1287_v11 = vld [vmem:[%s1480_s7 + $0xd4] sm:$0xf]  ;;  %v1238_v12 = vor.u32 %v1321_v1, %v1235_v2  ;;  %v1099_v13 = vld [vmem:[%s1480_s7 + $0xd8] sm:$0xf0]  ;;  %v1038_v18 = vor.u32 %v1271_v9, %v1035_v10  ;;  %v1269_v21 = vld [vmem:[%s1480_s7 + $0x44] sm:$0xf] }
  0x4d   : > { %675 = vmatpush.bf16.msra.mxu0 %v994_v39  ;;  %v1303_v14 = vld [vmem:[%s1480_s7 + $0x154] sm:$0xf]  ;;  %v1163_v15 = vld [vmem:[%s1480_s7 + $0x158] sm:$0xf0]  ;;  %v1102_v19 = vor.u32 %v1287_v11, %v1099_v13  ;;  %v1027_v22 = vld [vmem:[%s1480_s7 + $0x48] sm:$0xf0] }
  0x4e   : > { %689 = vmatpush.bf16.msra.mxu1 %v1058_v43  ;;  %v1319_v16 = vld [vmem:[%s1480_s7 + $0x1d4] sm:$0xf]  ;;  %v1227_v17 = vld [vmem:[%s1480_s7 + $0x1d8] sm:$0xf0]  ;;  %v1166_v20 = vor.u32 %v1303_v14, %v1163_v15  ;;  %v1285_v23 = vld [vmem:[%s1480_s7 + $0xc4] sm:$0xf]  ;;  %v1030_v30 = vor.u32 %v1269_v21, %v1027_v22 }
  0x4f   : > { %703 = vmatpush.bf16.msra.mxu2 %v1122_v44  ;;  %v1230_v24 = vor.u32 %v1319_v16, %v1227_v17  ;;  %v1091_v25 = vld [vmem:[%s1480_s7 + $0xc8] sm:$0xf0]  ;;  %v1301_v26 = vld [vmem:[%s1480_s7 + $0x144] sm:$0xf]  ;;  %v1267_v33 = vld [vmem:[%s1480_s7 + $0x34] sm:$0xf] }
  0x50   : > { %717 = vmatpush.bf16.msra.mxu3 %v1186_v49  ;;  %676 = vmatmul.bf16.vlgmr.msra.gmra.mxu0 %v1580_v4  ;;  %v1155_v27 = vld [vmem:[%s1480_s7 + $0x148] sm:$0xf0]  ;;  %v1317_v28 = vld [vmem:[%s1480_s7 + $0x1c4] sm:$0xf]  ;;  %v1094_v31 = vor.u32 %v1285_v23, %v1091_v25  ;;  %v1019_v34 = vld [vmem:[%s1480_s7 + $0x38] sm:$0xf0] }
  0x51   : > { %724 = vmatpush.bf16.msrb.mxu0 %v1054_v50  ;;  %690 = vmatmul.bf16.vlgmr.msra.gmra.mxu1 %v1582_v6  ;;  %v1219_v29 = vld [vmem:[%s1480_s7 + $0x1c8] sm:$0xf0]  ;;  %v1158_v32 = vor.u32 %v1301_v26, %v1155_v27  ;;  %v1283_v35 = vld [vmem:[%s1480_s7 + $0xb4] sm:$0xf]  ;;  %v1083_v37 = vld [vmem:[%s1480_s7 + $0xb8] sm:$0xf0]  ;;  %v1022_v42 = vor.u32 %v1267_v33, %v1019_v34 }
  0x52   : > { %738 = vmatpush.bf16.msrb.mxu1 %v1118_v55  ;;  %704 = vmatmul.bf16.vlgmr.msra.gmra.mxu2 %v1571_v61  ;;  %v1222_v36 = vor.u32 %v1317_v28, %v1219_v29  ;;  %v1299_v38 = vld [vmem:[%s1480_s7 + $0x134] sm:$0xf]  ;;  %v1147_v39 = vld [vmem:[%s1480_s7 + $0x138] sm:$0xf0]  ;;  %v1086_v43 = vor.u32 %v1283_v35, %v1083_v37  ;;  %v1265_v45 = vld [vmem:[%s1480_s7 + $0x24] sm:$0xf] }
  0x53   : > { %752 = vmatpush.bf16.msrb.mxu2 %v1182_v56  ;;  %718 = vmatmul.bf16.vlgmr.msra.gmra.mxu3 %v1578_v3  ;;  %v1315_v40 = vld [vmem:[%s1480_s7 + $0x1b4] sm:$0xf]  ;;  %v1211_v41 = vld [vmem:[%s1480_s7 + $0x1b8] sm:$0xf0]  ;;  %v1150_v44 = vor.u32 %v1299_v38, %v1147_v39  ;;  %v1011_v46 = vld [vmem:[%s1480_s7 + $0x28] sm:$0xf0] }
  0x54   : > { %766 = vmatpush.bf16.msrb.mxu3 %v1246_v60  ;;  %v1281_v47 = vld [vmem:[%s1480_s7 + $0xa4] sm:$0xf]  ;;  %v1214_v48 = vor.u32 %v1315_v40, %v1211_v41  ;;  %v1075_v49 = vld [vmem:[%s1480_s7 + $0xa8] sm:$0xf0]  ;;  %v1014_v54 = vor.u32 %v1265_v45, %v1011_v46  ;;  %v1263_v57 = vld [vmem:[%s1480_s7 + $0x14] sm:$0xf] }
  0x55   : > { %725 = vmatpush.bf16.msrb.mxu0 %v1046_v5  ;;  %v1297_v50 = vld [vmem:[%s1480_s7 + $0x124] sm:$0xf]  ;;  %v1139_v51 = vld [vmem:[%s1480_s7 + $0x128] sm:$0xf0]  ;;  %v1078_v55 = vor.u32 %v1281_v47, %v1075_v49  ;;  %v1003_v58 = vld [vmem:[%s1480_s7 + $0x18] sm:$0xf0] }
  0x56   : > { %739 = vmatpush.bf16.msrb.mxu1 %v1110_v7  ;;  %v1313_v52 = vld [vmem:[%s1480_s7 + $0x1a4] sm:$0xf]  ;;  %v1203_v53 = vld [vmem:[%s1480_s7 + $0x1a8] sm:$0xf0]  ;;  %v1142_v56 = vor.u32 %v1297_v50, %v1139_v51  ;;  %v1279_v59 = vld [vmem:[%s1480_s7 + $0x94] sm:$0xf]  ;;  %v1006_v5 = vor.u32 %v1263_v57, %v1003_v58 }
  0x57   : > { %753 = vmatpush.bf16.msrb.mxu2 %v1174_v8  ;;  %v1206_v60 = vor.u32 %v1313_v52, %v1203_v53  ;;  %v1067_v62 = vld [vmem:[%s1480_s7 + $0x98] sm:$0xf0]  ;;  %v1295_v63 = vld [vmem:[%s1480_s7 + $0x114] sm:$0xf]  ;;  %v1261_v9 = vld [vmem:[%s1480_s7 + $0x4] sm:$0xf] }
  0x58   : > { %767 = vmatpush.bf16.msrb.mxu3 %v1238_v12  ;;  %v1131_v0 = vld [vmem:[%s1480_s7 + $0x118] sm:$0xf0]  ;;  %v1311_v1 = vld [vmem:[%s1480_s7 + $0x194] sm:$0xf]  ;;  %v1070_v7 = vor.u32 %v1279_v59, %v1067_v62  ;;  %v995_v10 = vld [vmem:[%s1480_s7 + $0x8] sm:$0xf0] }
  0x59   : > { %726 = vmatpush.bf16.msrb.mxu0 %v1038_v18  ;;  %v1195_v2 = vld [vmem:[%s1480_s7 + $0x198] sm:$0xf0]  ;;  %v1134_v8 = vor.u32 %v1295_v63, %v1131_v0  ;;  %v1277_v11 = vld [vmem:[%s1480_s7 + $0x84] sm:$0xf]  ;;  %v1059_v13 = vld [vmem:[%s1480_s7 + $0x88] sm:$0xf0]  ;;  %v998_v18 = vor.u32 %v1261_v9, %v995_v10 }
  0x5a   : > { %740 = vmatpush.bf16.msrb.mxu1 %v1102_v19  ;;  %v1198_v12 = vor.u32 %v1311_v1, %v1195_v2  ;;  %v1293_v14 = vld [vmem:[%s1480_s7 + $0x104] sm:$0xf]  ;;  %v1123_v15 = vld [vmem:[%s1480_s7 + $0x108] sm:$0xf0]  ;;  %v1062_v19 = vor.u32 %v1277_v11, %v1059_v13  ;;  %v256_v28 = vld [vmem:[#allocation2 + $0x10] sm:$0xff]  ;;  %p1247_p12 = scmp.ne.s32.totalorder %s1397_s14, 3 }
  0x5b   : > { %754 = vmatpush.bf16.msrb.mxu2 %v1166_v20  ;;  %v1309_v16 = vld [vmem:[%s1480_s7 + $0x184] sm:$0xf]  ;;  %v1187_v17 = vld [vmem:[%s1480_s7 + $0x188] sm:$0xf0]  ;;  %v1126_v20 = vor.u32 %v1293_v14, %v1123_v15  ;;  %v258_v35 = vld [vmem:[#allocation2 + $0x18] sm:$0xff] }
  0x5c   : > { %768 = vmatpush.bf16.msrb.mxu3 %v1230_v24  ;;  %v1190_v21 = vor.u32 %v1309_v16, %v1187_v17  ;;  %v259_v50 = vld [vmem:[#allocation2 + $0x8] sm:$0xff] }
  0x5d   : > { %727 = vmatpush.bf16.msrb.mxu0 %v1030_v30 }
  0x5e   : > { %741 = vmatpush.bf16.msrb.mxu1 %v1094_v31 }
  0x5f   : > { %755 = vmatpush.bf16.msrb.mxu2 %v1158_v32 }
  0x60   : > { %769 = vmatpush.bf16.msrb.mxu3 %v1222_v36 }
  0x61   : > { %728 = vmatpush.bf16.msrb.mxu0 %v1022_v42  ;;  %v257_v42 = vld [vmem:[#allocation2] sm:$0xff] }
  0x62   : > { %742 = vmatpush.bf16.msrb.mxu1 %v1086_v43 }
  0x63   : > { %756 = vmatpush.bf16.msrb.mxu2 %v1150_v44 }
  0x64   : > { %770 = vmatpush.bf16.msrb.mxu3 %v1214_v48 }
  0x65   : > { %729 = vmatpush.bf16.msrb.mxu0 %v1014_v54 }
  0x66   : > { %743 = vmatpush.bf16.msrb.mxu1 %v1078_v55 }
  0x67   : > { %757 = vmatpush.bf16.msrb.mxu2 %v1142_v56 }
  0x68   : > { %771 = vmatpush.bf16.msrb.mxu3 %v1206_v60 }
  0x69   : > { %730 = vmatpush.bf16.msrb.mxu0 %v1006_v5 }
  0x6a   : > { %744 = vmatpush.bf16.msrb.mxu1 %v1070_v7 }
  0x6b   : > { %758 = vmatpush.bf16.msrb.mxu2 %v1134_v8 }
  0x6c   : > { %772 = vmatpush.bf16.msrb.mxu3 %v1198_v12 }
  0x6d   : > { %731 = vmatpush.bf16.msrb.mxu0 %v998_v18 }
  0x6e   : > { %745 = vmatpush.bf16.msrb.mxu1 %v1062_v19 }
  0x6f   : > { %759 = vmatpush.bf16.msrb.mxu2 %v1126_v20 }
  0x70   : > { %773 = vmatpush.bf16.msrb.mxu3 %v1190_v21  ;;  %732 = vmatmul.bf16.vlgmr.msrb.gmra.mxu0 %v1580_v4 }
  0x71   : > { %746 = vmatmul.bf16.vlgmr.msrb.gmra.mxu1 %v1582_v6 }
  0x72   : > { %760 = vmatmul.bf16.vlgmr.msrb.gmra.mxu2 %v1571_v61 }
  0x73   : > { %774 = vmatmul.bf16.vlgmr.msrb.gmra.mxu3 %v1578_v3 }
  0xcd   : > { %v677_v22 = vpop.f32.mrf.mxu0 }
  0xce   : > { %v691_v23 = vpop.f32.mrf.mxu1 }
  0xcf   : > { %v692_v24 = vadd.f32 %v691_v23, %v677_v22 }
  0xd5   : > { %v705_v25 = vpop.f32.mrf.mxu2  ;;  %v679_v30 = vpop.f32.mrf.mxu0 }
  0xd6   : > { %v706_v26 = vadd.f32 %v705_v25, %v692_v24  ;;  %v719_v27 = vpop.f32.mrf.mxu3  ;;  %v693_v31 = vpop.f32.mrf.mxu1 }
  0xd7   : > { %v694_v33 = vadd.f32 %v693_v31, %v679_v30 }
  0xd8   : > { %v720_v29 = vadd.f32 %v719_v27, %v706_v26 }
  0xda   : > { %v780_v32 = vadd.f32 %v720_v29, %v256_v28 }
  0xdc   : > { %784 = vst [vmem:[#allocation2 + $0x10] sm:$0xff] %v780_v32 }
  0xdd   : > { %v707_v4 = vpop.f32.mrf.mxu2 }
  0xde   : > { %v708_v34 = vadd.f32 %v707_v4, %v694_v33  ;;  %v721_v6 = vpop.f32.mrf.mxu3 }
  0xe0   : > { %v722_v61 = vadd.f32 %v721_v6, %v708_v34 }
  0xe2   : > { %v782_v36 = vadd.f32 %v722_v61, %v258_v35 }
  0xe4   : > { %786 = vst [vmem:[#allocation2 + $0x18] sm:$0xff] %v782_v36 }
  0xed   : > { %v733_v3 = vpop.f32.mrf.mxu0 }
  0xee   : > { %v747_v37 = vpop.f32.mrf.mxu1 }
  0xef   : > { %v748_v38 = vadd.f32 %v747_v37, %v733_v3 }
  0xf5   : > { %v761_v39 = vpop.f32.mrf.mxu2  ;;  %v735_v44 = vpop.f32.mrf.mxu0 }
  0xf6   : > { %v762_v40 = vadd.f32 %v761_v39, %v748_v38  ;;  %v775_v41 = vpop.f32.mrf.mxu3  ;;  %v749_v45 = vpop.f32.mrf.mxu1 }
  0xf7   : > { %v750_v47 = vadd.f32 %v749_v45, %v735_v44 }
  0xf8   : > { %v776_v43 = vadd.f32 %v775_v41, %v762_v40 }
  0xfa   : > { %v781_v46 = vadd.f32 %v776_v43, %v257_v42 }
  0xfc   : > { %785 = vst [vmem:[#allocation2] sm:$0xff] %v781_v46 }
  0xfd   : > { %v763_v48 = vpop.f32.mrf.mxu2 }
  0xfe   : > { %v764_v49 = vadd.f32 %v763_v48, %v750_v47  ;;  %v777_v51 = vpop.f32.mrf.mxu3 }
 0x100   : > { %v778_v52 = vadd.f32 %v777_v51, %v764_v49  ;;  %791 = sbr.rel (%p1247_p12) target bundleno = 282 (0x11a), region = 63 }
 0x102   : > { %v783_v53 = vadd.f32 %v778_v52, %v259_v50 }
 0x104   : > { %787 = vst [vmem:[#allocation2 + $0x8] sm:$0xff] %v783_v53 }
 0x105   : > { %v792_v54 = vld [vmem:[#allocation2 + $0x10] sm:$0xff]  ;;  %v793_v55 = vld [vmem:[#allocation2] sm:$0xff]  ;;  %v794_v56 = vld [vmem:[#allocation2 + $0x18] sm:$0xff]  ;;  %v839_v18 = vlaneseq  ;;  %vm835_vm0 = vcmask 1040384  }
 0x106   : > { %796 = vst [vmem:[%s1682_s2] sm:$0xff] %v792_v54  ;;  %v819_v57 = vrot.slane %v792_v54, 4  ;;  %v846_v58 = vmul.f32 %v792_v54, %v792_v54  ;;  %v826_v59 = vrot.slane %v793_v55, 4  ;;  %v847_v60 = vmul.f32 %v793_v55, %v793_v55  ;;  %v817_v23 = vld [vmem:[%s1683_s3] ss:$2 sm:$0x3] }
 0x107   : > { %797 = vst [vmem:[%s1682_s2 + $0x8] sm:$0xff] %v793_v55  ;;  %vm841_vm1 = vcmp.lt.s32.totalorder %v839_v18, 256  ;;  %v1248_v28 = vld [vmem:[%s1683_s3 + $0x1] ss:$2 sm:$0x3] }
 0x108   : > { %v820_v63 = vadd.f32 %v819_v57, %v792_v54  ;;  %v851_v0 = vrot.slane %v846_v58, 4  ;;  %v827_v1 = vadd.f32 %v826_v59, %v793_v55  ;;  %v858_v2 = vrot.slane %v847_v60, 4  ;;  %798 = vst [vmem:[%s1682_s2 + $0x10] sm:$0xff] %v794_v56 }
 0x10a   : > { %v821_v5 = vrot.slane %v820_v63, 2  ;;  %v852_v7 = vadd.f32 %v851_v0, %v846_v58  ;;  %v828_v8 = vrot.slane %v827_v1, 2  ;;  %v859_v9 = vadd.f32 %v858_v2, %v847_v60 }
 0x10b   : > { %v795_v62 = vld [vmem:[#allocation2 + $0x8] sm:$0xff] }
 0x10c   : > { %799 = vst [vmem:[%s1682_s2 + $0x18] sm:$0xff] %v795_v62  ;;  %v822_v10 = vadd.f32 %v821_v5, %v820_v63  ;;  %v853_v11 = vrot.slane %v852_v7, 2  ;;  %v829_v12 = vadd.f32 %v828_v8, %v827_v1  ;;  %v860_v13 = vrot.slane %v859_v9, 2 }
 0x10e   : > { %v823_v14 = vrot.slane %v822_v10, 1  ;;  %v830_v15 = vrot.slane %v829_v12, 1  ;;  %v854_v16 = vadd.f32 %v853_v11, %v852_v7  ;;  %v861_v17 = vadd.f32 %v860_v13, %v859_v9 }
 0x110   : > { %v824_v19 = vadd.f32 %v823_v14, %v822_v10  ;;  %v831_v20 = vadd.f32 %v830_v15, %v829_v12  ;;  %v855_v21 = vrot.slane %v854_v16, 1  ;;  %v862_v22 = vrot.slane %v861_v17, 1 }
 0x112   : > { %v834_v24 = vrot.slane %v831_v20, 7  ;;  %v856_v25 = vadd.f32 %v855_v21, %v854_v16  ;;  %v863_v26 = vadd.f32 %v862_v22, %v861_v17 }
 0x114   : > { %v836_v27 = vsel %vm835_vm0, %v824_v19, %v834_v24  ;;  %v866_v29 = vrot.slane %v863_v26, 7 }
 0x115   : > { %v838_v30 = vadd.f32 %v836_v27, %v817_v23 }
 0x116   : > { %v867_v31 = vsel %vm835_vm0, %v856_v25, %v866_v29 }
 0x117   : > { %843 = vst.msk [vmem:[%s1683_s3] ss:$2 sm:$0x3] %vm841_vm1, %v838_v30  ;;  %v869_v32 = vadd.f32 %v1248_v28, %v867_v31 }
 0x119   : > { %1249 = vst.msk [vmem:[%s1683_s3 + $0x1] ss:$2 sm:$0x3] %vm841_vm1, %v869_v32 }
 0x11a PF: > { %s14_s16 = sadd.s32 1, %s1405_s16   ;;  %s1684_s12 = smov %s1393_s13 }
 0x11b   : > { %p11_p13 = scmp.ge.s32.totalorder %s14_s16, 6   ;;  %s1685_s13 = smov %s1464_s20 }
 0x11c   : > { %s1686_s14 = smov %s1401_s15  ;;  %s1687_s15 = smov %s1689_s17 }
 0x11d   :  { %13 = sbr.rel (!%p11_p13) target bundleno = 3 (0x3), region = 110 }

// kernel: discriminator_forward.11
= control target key start
LH: loop header
LB: loop body
LE: loop exit
PB: predicated region body
PF: predicated region fallthrough
CT: control target
= control target key end

     0   :  { %s984_s12 = smov 0   ;;  %s986_s13 = smov 0   ;;  %s1104_s0 = inlined_call_operand.vmem [shape: bf16[16,4096], index: 0, kind: input, shape index: {}]   ;;  %s1105_s1 = inlined_call_operand.vmem [shape: bf16[4096,128], index: 1, kind: input, shape index: {}]   ;;  %s1106_s2 = inlined_call_operand.vmem [shape: f32[1,128], index: 2, kind: input, shape index: {}]   ;;  %s1107_s3 = inlined_call_operand.vmem [shape: f32[16,128], index: 3, kind: output, shape index: {}]  }
   0x1   :  { %s988_s14 = smov 0   ;;  %s990_s15 = smov 0  }
   0x2   :  { %s992_s16 = smov 0  }
   0x3 LB: > { %s22_s17 = sadd.s32 1, %s957_s15  ;;  %p41_p1 = scmp.ne.s32.totalorder %s949_s13, %s945_s12  ;;  %s961_s16 = sphi %s992_s16, %s13_s16   ;;  %s957_s15 = sphi %s990_s15, %s1111_s15   ;;  %s953_s14 = sphi %s988_s14, %s1110_s14   ;;  %s949_s13 = sphi %s986_s13, %s1109_s13   ;;  %s945_s12 = sphi %s984_s12, %s1108_s12  }
   0x4   : > { %p23_p0 = scmp.ge.s32.totalorder %s22_s17, 8  ;;  %p42_p2 = scmp.eq.s32.totalorder %s961_s16, 0 }
   0x5   : > { %s34_s19 = sadd.s32 1, %s949_s13  ;;  %p686_p5 = scmp.ge.s32.totalorder %s961_s16, 8 }
   0x6   : > { %s1113_s17 = smov (%p23_p0, %s22_s17), 0  ;;  %p43_p3 = por %p42_p2, %p41_p1 }
   0x7   : > { %s30_s18 = ssub.s32 %s957_s15, %s1113_s17  ;;  %143 = sbr.rel (%p686_p5) target bundleno = 20 (0x14), region = 20 }
   0x8   : > { %p32_p4 = scmp.eq.s32.totalorder %s30_s18, 0 }
   0xa   : > { %s1019_s20 = scalar_select %p32_p4, %s949_s13, %s34_s19  }
   0xc   : > { %146 = sbr.rel (!%p43_p3) target bundleno = 20 (0x14), region = 24  ;;  %s148_s21 = sand.u32 (%p43_p3), 1, %s949_s13  }
   0xd   : > { %s844_s22 = sshll.u32 (%p43_p3), %s957_s15, 4  ;;  %s687_s23 = sshll.u32 (%p43_p3), %s148_s21, 5 }
   0xe   : > { %s156_s26 = scalar_lea.vmem (%p43_p3), %s1104_s0, %s844_s22  ;;  %s150_s27 = scalar_lea.vmem (%p43_p3), [#allocation3], %s687_s23 }
   0xf   : > { %v169_v0 = vld [vmem:[%s156_s26] sm:$0xff] (%p43_p3)  ;;  %v171_v1 = vld [vmem:[%s156_s26 + $0x8] sm:$0xff] (%p43_p3) }
  0x10   : > { %v173_v2 = vld [vmem:[%s156_s26 + $0x80] sm:$0xff] (%p43_p3)  ;;  %170 = vst [vmem:[%s150_s27] sm:$0xff] (%p43_p3), %v169_v0  ;;  %v175_v3 = vld [vmem:[%s156_s26 + $0x88] sm:$0xff] (%p43_p3) }
  0x11   : > { %172 = vst [vmem:[%s150_s27 + $0x8] sm:$0xff] %v171_v1 }
  0x12   : > { %174 = vst [vmem:[%s150_s27 + $0x10] sm:$0xff] %v173_v2 }
  0x13   : > { %176 = vst [vmem:[%s150_s27 + $0x18] sm:$0xff] %v175_v3 }
  0x14 PF: > { %p690_p6 = scmp.ge.s32.totalorder %s961_s16, 1  ;;  %p190_p7 = scmp.lt.s32.totalorder %s961_s16, 9 }
  0x16   : > { %p191_p8 = pnand %p690_p6, %p190_p7 }
  0x17   : > { %s197_s28 = sand.u32 (!%p191_p8), 1, %s945_s12   ;;  %s692_s29 = sshll.u32 (!%p191_p8), %s953_s14, 6 }
  0x18   : > { %194 = sbr.rel (%p191_p8) target bundleno = 228 (0xe4), region = 51  ;;  %s691_s30 = sshll.u32 (!%p191_p8), %s197_s28, 5 }
  0x19   : > { %p228_p9 = scmp.lt.s32.totalorder (!%p191_p8), %s692_s29, 511  ;;  %s1036_s8 = scalar_lea.vmem (!%p191_p8), [#allocation3], %s691_s30 }
  0x1a   : > { %p694_p10 = scmp.ne.s32.totalorder (!%p191_p8), %s953_s14, 0 }
  0x1d   : > { %s1115_s29 = smov (!%p228_p9, %s692_s29), 511  ;;  %242 = sbr.rel (%p694_p10) target bundleno = 37 (0x25), region = 59 }
  0x1e   : > { %s693_s4 = sshll.u32 %s1115_s29, 2 }
  0x1f   : > { %s1034_s7 = scalar_lea.vmem %s1105_s1, %s693_s4 }
  0x22   : > { %v963_v4 = vmov 0.0  }
  0x23   : > { %243 = vst [vmem:[#allocation2] sm:$0xff] %v963_v4 }
  0x24   : > { %244 = vst [vmem:[#allocation2 + $0x8] sm:$0xff] %v963_v4 }
  0x25 PF: > { %v856_v5 = vld [vmem:[%s1034_s7 + $0x38] sm:$0xff]  ;;  %v855_v9 = vld [vmem:[%s1034_s7 + $0x30] sm:$0xff]  ;;  %v854_v13 = vld [vmem:[%s1034_s7 + $0x28] sm:$0xff]  ;;  %p839_p11 = scmp.ne.s32.totalorder %s953_s14, 7 }
  0x26   : > { %v864_v6 = vld [vmem:[%s1034_s7 + $0x78] sm:$0xff]  ;;  %527 = vmatpush.bf16.msra.mxu0 %v856_v5  ;;  %v863_v10 = vld [vmem:[%s1034_s7 + $0x70] sm:$0xff]  ;;  %v862_v14 = vld [vmem:[%s1034_s7 + $0x68] sm:$0xff] }
  0x27   : > { %v872_v7 = vld [vmem:[%s1034_s7 + $0xb8] sm:$0xff]  ;;  %541 = vmatpush.bf16.msra.mxu1 %v864_v6  ;;  %v871_v11 = vld [vmem:[%s1034_s7 + $0xb0] sm:$0xff]  ;;  %v870_v15 = vld [vmem:[%s1034_s7 + $0xa8] sm:$0xff] }
  0x28   : > { %v880_v8 = vld [vmem:[%s1034_s7 + $0xf8] sm:$0xff]  ;;  %555 = vmatpush.bf16.msra.mxu2 %v872_v7  ;;  %v879_v12 = vld [vmem:[%s1034_s7 + $0xf0] sm:$0xff]  ;;  %v878_v16 = vld [vmem:[%s1034_s7 + $0xe8] sm:$0xff] }
  0x29   : > { %569 = vmatpush.bf16.msra.mxu3 %v880_v8  ;;  %v853_v17 = vld [vmem:[%s1034_s7 + $0x20] sm:$0xff]  ;;  %v852_v21 = vld [vmem:[%s1034_s7 + $0x18] sm:$0xff]  ;;  %v851_v25 = vld [vmem:[%s1034_s7 + $0x10] sm:$0xff] }
  0x2a   : > { %528 = vmatpush.bf16.msra.mxu0 %v855_v9  ;;  %v861_v18 = vld [vmem:[%s1034_s7 + $0x60] sm:$0xff]  ;;  %v860_v22 = vld [vmem:[%s1034_s7 + $0x58] sm:$0xff]  ;;  %v859_v26 = vld [vmem:[%s1034_s7 + $0x50] sm:$0xff] }
  0x2b   : > { %542 = vmatpush.bf16.msra.mxu1 %v863_v10  ;;  %v869_v19 = vld [vmem:[%s1034_s7 + $0xa0] sm:$0xff]  ;;  %v868_v23 = vld [vmem:[%s1034_s7 + $0x98] sm:$0xff]  ;;  %v867_v27 = vld [vmem:[%s1034_s7 + $0x90] sm:$0xff] }
  0x2c   : > { %556 = vmatpush.bf16.msra.mxu2 %v871_v11  ;;  %v877_v20 = vld [vmem:[%s1034_s7 + $0xe0] sm:$0xff]  ;;  %v876_v24 = vld [vmem:[%s1034_s7 + $0xd8] sm:$0xff]  ;;  %v875_v28 = vld [vmem:[%s1034_s7 + $0xd0] sm:$0xff] }
  0x2d   : > { %570 = vmatpush.bf16.msra.mxu3 %v879_v12  ;;  %v850_v29 = vld [vmem:[%s1034_s7 + $0x8] sm:$0xff]  ;;  %v849_v33 = vld [vmem:[%s1034_s7] sm:$0xff]  ;;  %v697_v37 = vld [vmem:[%s1036_s8] sm:$0xf] }
  0x2e   : > { %529 = vmatpush.bf16.msra.mxu0 %v854_v13  ;;  %v858_v30 = vld [vmem:[%s1034_s7 + $0x48] sm:$0xff]  ;;  %v857_v34 = vld [vmem:[%s1034_s7 + $0x40] sm:$0xff]  ;;  %v845_v39 = vld [vmem:[%s1036_s8 + $0x4] sm:$0xf] }
  0x2f   : > { %543 = vmatpush.bf16.msra.mxu1 %v862_v14  ;;  %v866_v31 = vld [vmem:[%s1034_s7 + $0x88] sm:$0xff]  ;;  %v865_v35 = vld [vmem:[%s1034_s7 + $0x80] sm:$0xff]  ;;  %v705_v41 = vld [vmem:[%s1036_s8 + $0x8] sm:$0xf] }
  0x30   : > { %557 = vmatpush.bf16.msra.mxu2 %v870_v15  ;;  %v874_v32 = vld [vmem:[%s1034_s7 + $0xc8] sm:$0xff]  ;;  %v873_v36 = vld [vmem:[%s1034_s7 + $0xc0] sm:$0xff]  ;;  %v846_v43 = vld [vmem:[%s1036_s8 + $0xc] sm:$0xf] }
  0x31   : > { %571 = vmatpush.bf16.msra.mxu3 %v878_v16  ;;  %v847_v38 = vld [vmem:[%s1036_s8 + $0xc] sm:$0xf0]  ;;  %v699_v40 = vld [vmem:[%s1036_s8 + $0x10] sm:$0xf0]  ;;  %v848_v42 = vld [vmem:[%s1036_s8 + $0x14] sm:$0xf0] }
  0x32   : > { %530 = vmatpush.bf16.msra.mxu0 %v853_v17  ;;  %v707_v44 = vld [vmem:[%s1036_s8 + $0x18] sm:$0xf0]  ;;  %v698_v45 = vor.u32 %v847_v38, %v697_v37  ;;  %v702_v46 = vor.u32 %v845_v39, %v699_v40  ;;  %v706_v47 = vor.u32 %v848_v42, %v705_v41  ;;  %v245_v55 = vld [vmem:[#allocation2] sm:$0xff] }
  0x33   : > { %544 = vmatpush.bf16.msra.mxu1 %v861_v18  ;;  %v710_v48 = vor.u32 %v846_v43, %v707_v44  ;;  %v246_v63 = vld [vmem:[#allocation2 + $0x8] sm:$0xff] }
  0x34   : > { %558 = vmatpush.bf16.msra.mxu2 %v869_v19 }
  0x35   : > { %572 = vmatpush.bf16.msra.mxu3 %v877_v20 }
  0x36   : > { %531 = vmatpush.bf16.msra.mxu0 %v852_v21 }
  0x37   : > { %545 = vmatpush.bf16.msra.mxu1 %v860_v22 }
  0x38   : > { %559 = vmatpush.bf16.msra.mxu2 %v868_v23 }
  0x39   : > { %573 = vmatpush.bf16.msra.mxu3 %v876_v24 }
  0x3a   : > { %532 = vmatpush.bf16.msra.mxu0 %v851_v25 }
  0x3b   : > { %546 = vmatpush.bf16.msra.mxu1 %v859_v26 }
  0x3c   : > { %560 = vmatpush.bf16.msra.mxu2 %v867_v27 }
  0x3d   : > { %574 = vmatpush.bf16.msra.mxu3 %v875_v28 }
  0x3e   : > { %533 = vmatpush.bf16.msra.mxu0 %v850_v29 }
  0x3f   : > { %547 = vmatpush.bf16.msra.mxu1 %v858_v30 }
  0x40   : > { %561 = vmatpush.bf16.msra.mxu2 %v866_v31 }
  0x41   : > { %575 = vmatpush.bf16.msra.mxu3 %v874_v32 }
  0x42   : > { %534 = vmatpush.bf16.msra.mxu0 %v849_v33 }
  0x43   : > { %548 = vmatpush.bf16.msra.mxu1 %v857_v34 }
  0x44   : > { %562 = vmatpush.bf16.msra.mxu2 %v865_v35 }
  0x45   : > { %576 = vmatpush.bf16.msra.mxu3 %v873_v36  ;;  %535 = vmatmul.bf16.vlgmr.msra.gmra.mxu0 %v698_v45 }
  0x46   : > { %549 = vmatmul.bf16.vlgmr.msra.gmra.mxu1 %v702_v46 }
  0x47   : > { %563 = vmatmul.bf16.vlgmr.msra.gmra.mxu2 %v706_v47 }
  0x48   : > { %577 = vmatmul.bf16.vlgmr.msra.gmra.mxu3 %v710_v48 }
  0xc2   : > { %v536_v49 = vpop.f32.mrf.mxu0 }
  0xc3   : > { %v550_v50 = vpop.f32.mrf.mxu1 }
  0xc4   : > { %v551_v51 = vadd.f32 %v550_v50, %v536_v49 }
  0xca   : > { %v564_v52 = vpop.f32.mrf.mxu2  ;;  %v538_v57 = vpop.f32.mrf.mxu0 }
  0xcb   : > { %v578_v53 = vpop.f32.mrf.mxu3  ;;  %v565_v54 = vadd.f32 %v564_v52, %v551_v51  ;;  %v552_v58 = vpop.f32.mrf.mxu1 }
  0xcc   : > { %v553_v60 = vadd.f32 %v552_v58, %v538_v57 }
  0xcd   : > { %v579_v56 = vadd.f32 %v578_v53, %v565_v54 }
  0xcf   : > { %v583_v59 = vadd.f32 %v579_v56, %v245_v55 }
  0xd1   : > { %585 = vst [vmem:[#allocation2] sm:$0xff] %v583_v59 }
  0xd2   : > { %v566_v61 = vpop.f32.mrf.mxu2 }
  0xd3   : > { %v567_v62 = vadd.f32 %v566_v61, %v553_v60  ;;  %v580_v0 = vpop.f32.mrf.mxu3 }
  0xd5   : > { %v581_v1 = vadd.f32 %v580_v0, %v567_v62  ;;  %590 = sbr.rel (%p839_p11) target bundleno = 228 (0xe4), region = 63 }
  0xd7   : > { %v584_v2 = vadd.f32 %v581_v1, %v246_v63 }
  0xd9   : > { %586 = vst [vmem:[#allocation2 + $0x8] sm:$0xff] %v584_v2 }
  0xda   : > { %v591_v3 = vld [vmem:[#allocation2] sm:$0xff] }
  0xdb   : > { %v922_v4 = vld [vmem:[%s1106_s2] ss:$0 sm:$0xff] }
  0xdc   : > { %v597_v6 = vadd.f32 %v922_v4, %v591_v3 }
  0xde   : > { %599 = vst [vmem:[%s1107_s3] sm:$0xff] %v597_v6 }
  0xe0   : > { %v592_v5 = vld [vmem:[#allocation2 + $0x8] sm:$0xff] }
  0xe1   : > { %v598_v7 = vadd.f32 %v922_v4, %v592_v5 }
  0xe3   : > { %600 = vst [vmem:[%s1107_s3 + $0x8] sm:$0xff] %v598_v7 }
  0xe4 PF: > { %s13_s16 = sadd.s32 1, %s961_s16   ;;  %s1108_s12 = smov %s949_s13 }
  0xe5   : > { %p10_p12 = scmp.ge.s32.totalorder %s13_s16, 10   ;;  %s1109_s13 = smov %s1019_s20 }
  0xe6   : > { %s1110_s14 = smov %s957_s15  ;;  %s1111_s15 = smov %s1113_s17 }
  0xe7   :  { %12 = sbr.rel (!%p10_p12) target bundleno = 3 (0x3), region = 101 }

</bundles_post_ra>
